<compile_context>
chip_gen: v5e
topology: v5e:2x2
jax: 0.10.0
libtpu: 0.0.40
codegen_flags: <defaults>
</compile_context>

<pallas_src>
import functools
import math

import jax
import jax.numpy as jnp
from jax.experimental import pallas as pl
from jax.experimental.pallas import tpu as pltpu


# ----------------------------------------------------------------------------
# Fused LayerNorm + QKV projection + flash attention + output projection
# ----------------------------------------------------------------------------
def _layer_norm_f32(x, gamma, beta, eps=1e-5):
    m = jnp.mean(x, axis=-1, keepdims=True)
    v = jnp.mean((x - m) ** 2, axis=-1, keepdims=True)
    return (x - m) * jax.lax.rsqrt(v + eps) * gamma + beta


def fused_attention_kernel(
    q_ref, kv_ref,                       # activations [1, tq, D] / [1, tk, D]
    g_ref, b_ref,                        # LayerNorm gamma/beta [1, D] (f32)
    wq_ref, wk_ref, wv_ref,              # pre-transposed weights [D, D] (compute dtype)
    bq_ref, bk_ref, bv_ref,              # biases [1, D] (f32)
    wo_ref, bo_ref,                      # out-proj weight [D, D] / bias [1, D]
    o_ref,                               # output [1, tq, D]
    q_scr, k_scr, v_scr,                 # head-major staging [H, t, hd] (compute dtype)
    m_scr, l_scr, acc_scr,               # online-softmax state (f32)
    *, n_heads, scale, compute_dtype):

    ki = pl.program_id(2)
    nk = pl.num_programs(2)

    D = q_ref.shape[-1]
    hd = D // n_heads

    gamma = g_ref[...].astype(jnp.float32)
    beta = b_ref[...].astype(jnp.float32)

    # -------- once per (batch, q-tile): LN(q) + Q projection (scale folded) ----
    @pl.when(ki == 0)
    def _():
        qn = _layer_norm_f32(q_ref[0].astype(jnp.float32), gamma, beta)   # [tq, D]
        Q = jnp.dot(qn.astype(compute_dtype), wq_ref[...],
                    preferred_element_type=jnp.float32) + bq_ref[...]
        Q = Q * scale                                   # fold 1/sqrt(hd) into Q once
        for h in range(n_heads):                        # layout staging only
            q_scr[h] = Q[:, h * hd:(h + 1) * hd].astype(compute_dtype)
        m_scr[...] = jnp.full(m_scr.shape, -jnp.inf, dtype=jnp.float32)
        l_scr[...] = jnp.zeros(l_scr.shape, dtype=jnp.float32)
        acc_scr[...] = jnp.zeros(acc_scr.shape, dtype=jnp.float32)

    # -------- every kv tile: LN(kv) + K/V projection ---------------------------
    kvn = _layer_norm_f32(kv_ref[0].astype(jnp.float32), gamma, beta)     # [tk, D]
    kvn_c = kvn.astype(compute_dtype)
    K = jnp.dot(kvn_c, wk_ref[...], preferred_element_type=jnp.float32) + bk_ref[...]
    V = jnp.dot(kvn_c, wv_ref[...], preferred_element_type=jnp.float32) + bv_ref[...]
    for h in range(n_heads):                            # layout staging only
        k_scr[h] = K[:, h * hd:(h + 1) * hd].astype(compute_dtype)
        v_scr[h] = V[:, h * hd:(h + 1) * hd].astype(compute_dtype)

    # -------- online-softmax flash update, batched over heads ------------------
    s = jnp.einsum('hqd,hkd->hqk', q_scr[...], k_scr[...],
                   preferred_element_type=jnp.float32)                    # [H, tq, tk]
    m_prev = m_scr[...]                                                   # [H, tq, 1]
    m_new = jnp.maximum(m_prev, jnp.max(s, axis=-1, keepdims=True))
    alpha = jnp.exp(m_prev - m_new)
    p = jnp.exp(s - m_new)                                                # f32
    l_scr[...] = alpha * l_scr[...] + jnp.sum(p, axis=-1, keepdims=True)
    acc_scr[...] = alpha * acc_scr[...] + jnp.einsum(
        'hqk,hkd->hqd', p.astype(compute_dtype), v_scr[...],
        preferred_element_type=jnp.float32)                               # [H, tq, hd]
    m_scr[...] = m_new

    # -------- epilogue: normalize, merge heads, output projection --------------
    @pl.when(ki == nk - 1)
    def _():
        ctx = acc_scr[...] * pl.reciprocal(l_scr[...], approx=True)       # [H, tq, hd]
        ctx2 = jnp.concatenate([ctx[h] for h in range(n_heads)], axis=-1) # [tq, D]
        out = jnp.dot(ctx2.astype(compute_dtype), wo_ref[...],
                      preferred_element_type=jnp.float32) + bo_ref[...]
        o_ref[0] = out.astype(o_ref.dtype)


# ----------------------------------------------------------------------------
# Wrapper: weight unpacking, tiling, pallas_call setup
# ----------------------------------------------------------------------------
def attention_forward(q, kv, params, n_heads, *, q_block=128, kv_block=128,
                      compute_dtype=jnp.bfloat16):
    B, N, D = q.shape
    _, S, _ = kv.shape
    assert D % n_heads == 0
    hd = D // n_heads

    tq = N if N <= q_block else q_block
    tk = S if S <= kv_block else kv_block
    assert N % tq == 0 and S % tk == 0, "sequence length must divide tile size"
    nq, nk = N // tq, S // tk

    # Split PyTorch-style packed in_proj weight/bias, pre-transpose so the
    # kernel computes x @ W, and pre-cast weights to the MXU compute dtype.
    wq, wk, wv = jnp.split(params["in_w"], 3, axis=0)            # each [D, D]
    bq, bk, bv = jnp.split(params["in_b"], 3)                    # each [D]
    wq_t = wq.T.astype(compute_dtype)
    wk_t = wk.T.astype(compute_dtype)
    wv_t = wv.T.astype(compute_dtype)
    wo_t = params["out_w"].T.astype(compute_dtype)
    bq = bq.reshape(1, D).astype(jnp.float32)
    bk = bk.reshape(1, D).astype(jnp.float32)
    bv = bv.reshape(1, D).astype(jnp.float32)
    bo = params["out_b"].reshape(1, D).astype(jnp.float32)
    gamma = params["gamma"].reshape(1, D).astype(jnp.float32)
    beta = params["beta"].reshape(1, D).astype(jnp.float32)

    mat_spec = pl.BlockSpec((D, D), lambda b, qi, ki: (0, 0))    # grid-invariant
    vec_spec = pl.BlockSpec((1, D), lambda b, qi, ki: (0, 0))

    kernel = functools.partial(fused_attention_kernel, n_heads=n_heads,
                               scale=1.0 / math.sqrt(hd),
                               compute_dtype=compute_dtype)

    return pl.pallas_call(
        kernel,
        out_shape=jax.ShapeDtypeStruct((B, N, D), q.dtype),
        grid_spec=pltpu.PrefetchScalarGridSpec(
            num_scalar_prefetch=0,
            grid=(B, nq, nk),
            in_specs=[
                pl.BlockSpec((1, tq, D), lambda b, qi, ki: (b, qi, 0)),  # q
                pl.BlockSpec((1, tk, D), lambda b, qi, ki: (b, ki, 0)),  # kv
                vec_spec, vec_spec,                                      # gamma, beta
                mat_spec, mat_spec, mat_spec,                            # Wq^T, Wk^T, Wv^T
                vec_spec, vec_spec, vec_spec,                            # bq, bk, bv
                mat_spec, vec_spec,                                      # Wo^T, bo
            ],
            out_specs=pl.BlockSpec((1, tq, D), lambda b, qi, ki: (b, qi, 0)),
            scratch_shapes=[
                pltpu.VMEM((n_heads, tq, hd), compute_dtype),   # Q (head-major, scaled)
                pltpu.VMEM((n_heads, tk, hd), compute_dtype),   # K staging
                pltpu.VMEM((n_heads, tk, hd), compute_dtype),   # V staging
                pltpu.VMEM((n_heads, tq, 1), jnp.float32),      # running max m
                pltpu.VMEM((n_heads, tq, 1), jnp.float32),      # running sum l
                pltpu.VMEM((n_heads, tq, hd), jnp.float32),     # output accumulator
            ]),
        compiler_params=pltpu.CompilerParams(
            dimension_semantics=("parallel", "parallel", "arbitrary"),
            vmem_limit_bytes=64 * 1024 * 1024),
    )(q, kv, gamma, beta, wq_t, wk_t, wv_t, bq, bk, bv, wo_t, bo)


# ----------------------------------------------------------------------------
# Pure-JAX reference (mirrors nn.LayerNorm + nn.MultiheadAttention math)
# ----------------------------------------------------------------------------
def reference_forward(q, kv, params, n_heads):
    def ln(x):
        m = jnp.mean(x, axis=-1, keepdims=True)
        v = jnp.mean((x - m) ** 2, axis=-1, keepdims=True)
        return (x - m) / jnp.sqrt(v + 1e-5) * params["gamma"] + params["beta"]

    qn, kvn = ln(q), ln(kv)
    wq, wk, wv = jnp.split(params["in_w"], 3, axis=0)
    bq, bk, bv = jnp.split(params["in_b"], 3)
    Q = qn @ wq.T + bq
    K = kvn @ wk.T + bk
    V = kvn @ wv.T + bv
    B, N, D = Q.shape
    S = K.shape[1]
    hd = D // n_heads
    Qh = Q.reshape(B, N, n_heads, hd).transpose(0, 2, 1, 3)
    Kh = K.reshape(B, S, n_heads, hd).transpose(0, 2, 1, 3)
    Vh = V.reshape(B, S, n_heads, hd).transpose(0, 2, 1, 3)
    s = jnp.einsum("bhnd,bhsd->bhns", Qh, Kh) / math.sqrt(hd)
    p = jax.nn.softmax(s, axis=-1)
    ctx = jnp.einsum("bhns,bhsd->bhnd", p, Vh).transpose(0, 2, 1, 3).reshape(B, N, D)
    return ctx @ params["out_w"].T + params["out_b"]


if __name__ == "__main__":
    # Small shapes consistent with the module's forward: q, kv : [b, n, dim]
    B, N, DIM, N_HEADS = 2, 8, 32, 4

    key = jax.random.PRNGKey(0)
    k_q, k_kv, k_inw, k_inb, k_ow, k_ob = jax.random.split(key, 6)

    q = jax.random.normal(k_q, (B, N, DIM), dtype=jnp.float32)
    kv = jax.random.normal(k_kv, (B, N, DIM), dtype=jnp.float32)

    # Deterministic synthetic parameters (shapes match nn.LayerNorm(dim) and
    # nn.MultiheadAttention(dim, n_heads): in_proj (3*dim, dim), out_proj (dim, dim)).
    params = {
        "gamma": jnp.ones((DIM,), dtype=jnp.float32),
        "beta": jnp.zeros((DIM,), dtype=jnp.float32),
        "in_w": 0.05 * jax.random.normal(k_inw, (3 * DIM, DIM), dtype=jnp.float32),
        "in_b": 0.01 * jax.random.normal(k_inb, (3 * DIM,), dtype=jnp.float32),
        "out_w": 0.05 * jax.random.normal(k_ow, (DIM, DIM), dtype=jnp.float32),
        "out_b": 0.01 * jax.random.normal(k_ob, (DIM,), dtype=jnp.float32),
    }

    out = attention_forward(q, kv, params, N_HEADS)
    out = jax.block_until_ready(out)

    ref = reference_forward(q, kv, params, N_HEADS)
    assert out.shape == (B, N, DIM), out.shape
    # bf16 MXU operands (f32 accumulation) -> relaxed tolerance vs f32 reference.
    max_err = float(jnp.max(jnp.abs(out - ref)))
    assert jnp.allclose(out, ref, atol=2e-2, rtol=2e-2), f"mismatch (max abs err {max_err})"

    print("KERNEL_OK")
</pallas_src>

<mosaic_0001>
module attributes {stable_mosaic.version = 11 : i64} {
  func.func @fused_attention_kernel(%arg0: i32, %arg1: i32, %arg2: i32, %arg3: memref<1x8x32xf32, #tpu.memory_space<vmem>>, %arg4: memref<1x8x32xf32, #tpu.memory_space<vmem>>, %arg5: memref<1x32xf32, #tpu.memory_space<vmem>>, %arg6: memref<1x32xf32, #tpu.memory_space<vmem>>, %arg7: memref<32x32xbf16, #tpu.memory_space<vmem>>, %arg8: memref<32x32xbf16, #tpu.memory_space<vmem>>, %arg9: memref<32x32xbf16, #tpu.memory_space<vmem>>, %arg10: memref<1x32xf32, #tpu.memory_space<vmem>>, %arg11: memref<1x32xf32, #tpu.memory_space<vmem>>, %arg12: memref<1x32xf32, #tpu.memory_space<vmem>>, %arg13: memref<32x32xbf16, #tpu.memory_space<vmem>>, %arg14: memref<1x32xf32, #tpu.memory_space<vmem>>, %arg15: memref<1x8x32xf32, #tpu.memory_space<vmem>>, %arg16: memref<4x8x8xbf16, #tpu.memory_space<vmem>>, %arg17: memref<4x8x8xbf16, #tpu.memory_space<vmem>>, %arg18: memref<4x8x8xbf16, #tpu.memory_space<vmem>>, %arg19: memref<4x8x1xf32, #tpu.memory_space<vmem>>, %arg20: memref<4x8x1xf32, #tpu.memory_space<vmem>>, %arg21: memref<4x8x8xf32, #tpu.memory_space<vmem>>) attributes {dimension_semantics = [#tpu.dimension_semantics<parallel>, #tpu.dimension_semantics<parallel>, #tpu.dimension_semantics<arbitrary>], iteration_bounds = array<i64: 2, 1, 1>, scalar_prefetch = 0 : i64, scratch_operands = 6 : i64, tpu.core_type = #tpu.core_type<tc>, window_params = [{transform_indices = @transform_0, window_bounds = array<i64: 1, 8, 32>}, {transform_indices = @transform_1, window_bounds = array<i64: 1, 8, 32>}, {pipeline_mode = #tpu.pipeline_mode<synchronous>, transform_indices = @transform_2, window_bounds = array<i64: 1, 32>}, {pipeline_mode = #tpu.pipeline_mode<synchronous>, transform_indices = @transform_3, window_bounds = array<i64: 1, 32>}, {pipeline_mode = #tpu.pipeline_mode<synchronous>, transform_indices = @transform_4, window_bounds = array<i64: 32, 32>}, {pipeline_mode = #tpu.pipeline_mode<synchronous>, transform_indices = @transform_5, window_bounds = array<i64: 32, 32>}, {pipeline_mode = #tpu.pipeline_mode<synchronous>, transform_indices = @transform_6, window_bounds = array<i64: 32, 32>}, {pipeline_mode = #tpu.pipeline_mode<synchronous>, transform_indices = @transform_7, window_bounds = array<i64: 1, 32>}, {pipeline_mode = #tpu.pipeline_mode<synchronous>, transform_indices = @transform_8, window_bounds = array<i64: 1, 32>}, {pipeline_mode = #tpu.pipeline_mode<synchronous>, transform_indices = @transform_9, window_bounds = array<i64: 1, 32>}, {pipeline_mode = #tpu.pipeline_mode<synchronous>, transform_indices = @transform_10, window_bounds = array<i64: 32, 32>}, {pipeline_mode = #tpu.pipeline_mode<synchronous>, transform_indices = @transform_11, window_bounds = array<i64: 1, 32>}, {transform_indices = @transform_12, window_bounds = array<i64: 1, 8, 32>}]} {
    %c0 = arith.constant 0 : index
    %c0_0 = arith.constant 0 : index
    %0 = vector.load %arg5[%c0, %c0_0] : memref<1x32xf32, #tpu.memory_space<vmem>>, vector<1x32xf32>
    %c0_1 = arith.constant 0 : index
    %c0_2 = arith.constant 0 : index
    %1 = vector.load %arg6[%c0_1, %c0_2] : memref<1x32xf32, #tpu.memory_space<vmem>>, vector<1x32xf32>
    %c0_i32 = arith.constant 0 : i32
    %2 = arith.cmpi eq, %arg2, %c0_i32 : i32
    %3 = arith.extui %2 : i1 to i32
    %c0_i32_3 = arith.constant 0 : i32
    %4 = arith.cmpi ne, %3, %c0_i32_3 : i32
    scf.if %4 {
      %c0_75 = arith.constant 0 : index
      %c0_76 = arith.constant 0 : index
      %c0_77 = arith.constant 0 : index
      %110 = vector.load %arg3[%c0_75, %c0_76, %c0_77] : memref<1x8x32xf32, #tpu.memory_space<vmem>>, vector<1x8x32xf32>
      %111 = vector.shape_cast %110 : vector<1x8x32xf32> to vector<8x32xf32>
      %cst_78 = arith.constant dense<0.000000e+00> : vector<8xf32>
      %112 = vector.multi_reduction <add>, %111, %cst_78 [1] : vector<8x32xf32> to vector<8xf32>
      %113 = vector.shape_cast %112 : vector<8xf32> to vector<8x1xf32>
      %cst_79 = arith.constant 3.200000e+01 : f32
      %114 = vector.broadcast %cst_79 : f32 to vector<8x1xf32>
      %115 = arith.divf %113, %114 : vector<8x1xf32>
      %116 = vector.broadcast %115 : vector<8x1xf32> to vector<8x32xf32>
      %117 = arith.subf %111, %116 : vector<8x32xf32>
      %118 = arith.mulf %117, %117 : vector<8x32xf32>
      %cst_80 = arith.constant dense<0.000000e+00> : vector<8xf32>
      %119 = vector.multi_reduction <add>, %118, %cst_80 [1] : vector<8x32xf32> to vector<8xf32>
      %120 = vector.shape_cast %119 : vector<8xf32> to vector<8x1xf32>
      %cst_81 = arith.constant 3.200000e+01 : f32
      %121 = vector.broadcast %cst_81 : f32 to vector<8x1xf32>
      %122 = arith.divf %120, %121 : vector<8x1xf32>
      %123 = vector.broadcast %115 : vector<8x1xf32> to vector<8x32xf32>
      %124 = arith.subf %111, %123 : vector<8x32xf32>
      %cst_82 = arith.constant 9.99999974E-6 : f32
      %125 = vector.broadcast %cst_82 : f32 to vector<8x1xf32>
      %126 = arith.addf %122, %125 : vector<8x1xf32>
      %127 = math.rsqrt %126 : vector<8x1xf32>
      %128 = vector.broadcast %127 : vector<8x1xf32> to vector<8x32xf32>
      %129 = arith.mulf %124, %128 : vector<8x32xf32>
      %130 = vector.broadcast %0 : vector<1x32xf32> to vector<8x32xf32>
      %131 = arith.mulf %129, %130 : vector<8x32xf32>
      %132 = vector.broadcast %1 : vector<1x32xf32> to vector<8x32xf32>
      %133 = arith.addf %131, %132 : vector<8x32xf32>
      %134 = arith.truncf %133 : vector<8x32xf32> to vector<8x32xbf16>
      %c0_83 = arith.constant 0 : index
      %c0_84 = arith.constant 0 : index
      %135 = vector.load %arg7[%c0_83, %c0_84] : memref<32x32xbf16, #tpu.memory_space<vmem>>, vector<32x32xbf16>
      %cst_85 = arith.constant dense<0.000000e+00> : vector<8x32xf32>
      %136 = tpu.matmul %134, %135, %cst_85 {dimension_numbers = #tpu.dot_dimension_numbers<[1], [0], [0], [1], [0, 0, 1, 1], [], []>} : vector<8x32xbf16>, vector<32x32xbf16>, vector<8x32xf32> -> vector<8x32xf32>
      %c0_86 = arith.constant 0 : index
      %c0_87 = arith.constant 0 : index
      %137 = vector.load %arg10[%c0_86, %c0_87] : memref<1x32xf32, #tpu.memory_space<vmem>>, vector<1x32xf32>
      %138 = vector.broadcast %137 : vector<1x32xf32> to vector<8x32xf32>
      %139 = arith.addf %136, %138 : vector<8x32xf32>
      %cst_88 = arith.constant 0.353553385 : f32
      %140 = vector.broadcast %cst_88 : f32 to vector<8x32xf32>
      %141 = arith.mulf %139, %140 : vector<8x32xf32>
      %142 = vector.extract_strided_slice %141 {offsets = [0, 0], sizes = [8, 8], strides = [1, 1]} : vector<8x32xf32> to vector<8x8xf32>
      %143 = arith.truncf %142 : vector<8x8xf32> to vector<8x8xbf16>
      %c0_89 = arith.constant 0 : index
      %c0_90 = arith.constant 0 : index
      %c0_91 = arith.constant 0 : index
      %144 = vector.load %arg16[%c0_89, %c0_90, %c0_91] : memref<4x8x8xbf16, #tpu.memory_space<vmem>>, vector<1x8x8xbf16>
      %145 = vector.shape_cast %144 : vector<1x8x8xbf16> to vector<8x8xbf16>
      %146 = vector.shape_cast %143 : vector<8x8xbf16> to vector<1x8x8xbf16>
      tpu.vector_store %arg16[%c0_89, %c0_90, %c0_91], %146 {strides = array<i32>} : memref<4x8x8xbf16, #tpu.memory_space<vmem>>, vector<1x8x8xbf16>,
      %147 = vector.extract_strided_slice %141 {offsets = [0, 8], sizes = [8, 8], strides = [1, 1]} : vector<8x32xf32> to vector<8x8xf32>
      %148 = arith.truncf %147 : vector<8x8xf32> to vector<8x8xbf16>
      %c1_92 = arith.constant 1 : index
      %c0_93 = arith.constant 0 : index
      %c0_94 = arith.constant 0 : index
      %149 = vector.load %arg16[%c1_92, %c0_93, %c0_94] : memref<4x8x8xbf16, #tpu.memory_space<vmem>>, vector<1x8x8xbf16>
      %150 = vector.shape_cast %149 : vector<1x8x8xbf16> to vector<8x8xbf16>
      %151 = vector.shape_cast %148 : vector<8x8xbf16> to vector<1x8x8xbf16>
      tpu.vector_store %arg16[%c1_92, %c0_93, %c0_94], %151 {strides = array<i32>} : memref<4x8x8xbf16, #tpu.memory_space<vmem>>, vector<1x8x8xbf16>,
      %152 = vector.extract_strided_slice %141 {offsets = [0, 16], sizes = [8, 8], strides = [1, 1]} : vector<8x32xf32> to vector<8x8xf32>
      %153 = arith.truncf %152 : vector<8x8xf32> to vector<8x8xbf16>
      %c2_95 = arith.constant 2 : index
      %c0_96 = arith.constant 0 : index
      %c0_97 = arith.constant 0 : index
      %154 = vector.load %arg16[%c2_95, %c0_96, %c0_97] : memref<4x8x8xbf16, #tpu.memory_space<vmem>>, vector<1x8x8xbf16>
      %155 = vector.shape_cast %154 : vector<1x8x8xbf16> to vector<8x8xbf16>
      %156 = vector.shape_cast %153 : vector<8x8xbf16> to vector<1x8x8xbf16>
      tpu.vector_store %arg16[%c2_95, %c0_96, %c0_97], %156 {strides = array<i32>} : memref<4x8x8xbf16, #tpu.memory_space<vmem>>, vector<1x8x8xbf16>,
      %157 = vector.extract_strided_slice %141 {offsets = [0, 24], sizes = [8, 8], strides = [1, 1]} : vector<8x32xf32> to vector<8x8xf32>
      %158 = arith.truncf %157 : vector<8x8xf32> to vector<8x8xbf16>
      %c3_98 = arith.constant 3 : index
      %c0_99 = arith.constant 0 : index
      %c0_100 = arith.constant 0 : index
      %159 = vector.load %arg16[%c3_98, %c0_99, %c0_100] : memref<4x8x8xbf16, #tpu.memory_space<vmem>>, vector<1x8x8xbf16>
      %160 = vector.shape_cast %159 : vector<1x8x8xbf16> to vector<8x8xbf16>
      %161 = vector.shape_cast %158 : vector<8x8xbf16> to vector<1x8x8xbf16>
      tpu.vector_store %arg16[%c3_98, %c0_99, %c0_100], %161 {strides = array<i32>} : memref<4x8x8xbf16, #tpu.memory_space<vmem>>, vector<1x8x8xbf16>,
      %cst_101 = arith.constant 0xFF800000 : f32
      %162 = vector.broadcast %cst_101 : f32 to vector<4x8x1xf32>
      %c0_102 = arith.constant 0 : index
      %c0_103 = arith.constant 0 : index
      %c0_104 = arith.constant 0 : index
      %163 = vector.load %arg19[%c0_102, %c0_103, %c0_104] : memref<4x8x1xf32, #tpu.memory_space<vmem>>, vector<4x8x1xf32>
      tpu.vector_store %arg19[%c0_102, %c0_103, %c0_104], %162 {strides = array<i32>} : memref<4x8x1xf32, #tpu.memory_space<vmem>>, vector<4x8x1xf32>,
      %cst_105 = arith.constant 0.000000e+00 : f32
      %164 = vector.broadcast %cst_105 : f32 to vector<4x8x1xf32>
      %c0_106 = arith.constant 0 : index
      %c0_107 = arith.constant 0 : index
      %c0_108 = arith.constant 0 : index
      %165 = vector.load %arg20[%c0_106, %c0_107, %c0_108] : memref<4x8x1xf32, #tpu.memory_space<vmem>>, vector<4x8x1xf32>
      tpu.vector_store %arg20[%c0_106, %c0_107, %c0_108], %164 {strides = array<i32>} : memref<4x8x1xf32, #tpu.memory_space<vmem>>, vector<4x8x1xf32>,
      %cst_109 = arith.constant 0.000000e+00 : f32
      %166 = vector.broadcast %cst_109 : f32 to vector<4x8x8xf32>
      %c0_110 = arith.constant 0 : index
      %c0_111 = arith.constant 0 : index
      %c0_112 = arith.constant 0 : index
      %167 = vector.load %arg21[%c0_110, %c0_111, %c0_112] : memref<4x8x8xf32, #tpu.memory_space<vmem>>, vector<4x8x8xf32>
      tpu.vector_store %arg21[%c0_110, %c0_111, %c0_112], %166 {strides = array<i32>} : memref<4x8x8xf32, #tpu.memory_space<vmem>>, vector<4x8x8xf32>,
    } else {
    }
    %c0_4 = arith.constant 0 : index
    %c0_5 = arith.constant 0 : index
    %c0_6 = arith.constant 0 : index
    %5 = vector.load %arg4[%c0_4, %c0_5, %c0_6] : memref<1x8x32xf32, #tpu.memory_space<vmem>>, vector<1x8x32xf32>
    %6 = vector.shape_cast %5 : vector<1x8x32xf32> to vector<8x32xf32>
    %cst = arith.constant dense<0.000000e+00> : vector<8xf32>
    %7 = vector.multi_reduction <add>, %6, %cst [1] : vector<8x32xf32> to vector<8xf32>
    %8 = vector.shape_cast %7 : vector<8xf32> to vector<8x1xf32>
    %cst_7 = arith.constant 3.200000e+01 : f32
    %9 = vector.broadcast %cst_7 : f32 to vector<8x1xf32>
    %10 = arith.divf %8, %9 : vector<8x1xf32>
    %11 = vector.broadcast %10 : vector<8x1xf32> to vector<8x32xf32>
    %12 = arith.subf %6, %11 : vector<8x32xf32>
    %13 = arith.mulf %12, %12 : vector<8x32xf32>
    %cst_8 = arith.constant dense<0.000000e+00> : vector<8xf32>
    %14 = vector.multi_reduction <add>, %13, %cst_8 [1] : vector<8x32xf32> to vector<8xf32>
    %15 = vector.shape_cast %14 : vector<8xf32> to vector<8x1xf32>
    %cst_9 = arith.constant 3.200000e+01 : f32
    %16 = vector.broadcast %cst_9 : f32 to vector<8x1xf32>
    %17 = arith.divf %15, %16 : vector<8x1xf32>
    %18 = vector.broadcast %10 : vector<8x1xf32> to vector<8x32xf32>
    %19 = arith.subf %6, %18 : vector<8x32xf32>
    %cst_10 = arith.constant 9.99999974E-6 : f32
    %20 = vector.broadcast %cst_10 : f32 to vector<8x1xf32>
    %21 = arith.addf %17, %20 : vector<8x1xf32>
    %22 = math.rsqrt %21 : vector<8x1xf32>
    %23 = vector.broadcast %22 : vector<8x1xf32> to vector<8x32xf32>
    %24 = arith.mulf %19, %23 : vector<8x32xf32>
    %25 = vector.broadcast %0 : vector<1x32xf32> to vector<8x32xf32>
    %26 = arith.mulf %24, %25 : vector<8x32xf32>
    %27 = vector.broadcast %1 : vector<1x32xf32> to vector<8x32xf32>
    %28 = arith.addf %26, %27 : vector<8x32xf32>
    %29 = arith.truncf %28 : vector<8x32xf32> to vector<8x32xbf16>
    %c0_11 = arith.constant 0 : index
    %c0_12 = arith.constant 0 : index
    %30 = vector.load %arg8[%c0_11, %c0_12] : memref<32x32xbf16, #tpu.memory_space<vmem>>, vector<32x32xbf16>
    %cst_13 = arith.constant dense<0.000000e+00> : vector<8x32xf32>
    %31 = tpu.matmul %29, %30, %cst_13 {dimension_numbers = #tpu.dot_dimension_numbers<[1], [0], [0], [1], [0, 0, 1, 1], [], []>} : vector<8x32xbf16>, vector<32x32xbf16>, vector<8x32xf32> -> vector<8x32xf32>
    %c0_14 = arith.constant 0 : index
    %c0_15 = arith.constant 0 : index
    %32 = vector.load %arg11[%c0_14, %c0_15] : memref<1x32xf32, #tpu.memory_space<vmem>>, vector<1x32xf32>
    %33 = vector.broadcast %32 : vector<1x32xf32> to vector<8x32xf32>
    %34 = arith.addf %31, %33 : vector<8x32xf32>
    %c0_16 = arith.constant 0 : index
    %c0_17 = arith.constant 0 : index
    %35 = vector.load %arg9[%c0_16, %c0_17] : memref<32x32xbf16, #tpu.memory_space<vmem>>, vector<32x32xbf16>
    %cst_18 = arith.constant dense<0.000000e+00> : vector<8x32xf32>
    %36 = tpu.matmul %29, %35, %cst_18 {dimension_numbers = #tpu.dot_dimension_numbers<[1], [0], [0], [1], [0, 0, 1, 1], [], []>} : vector<8x32xbf16>, vector<32x32xbf16>, vector<8x32xf32> -> vector<8x32xf32>
    %c0_19 = arith.constant 0 : index
    %c0_20 = arith.constant 0 : index
    %37 = vector.load %arg12[%c0_19, %c0_20] : memref<1x32xf32, #tpu.memory_space<vmem>>, vector<1x32xf32>
    %38 = vector.broadcast %37 : vector<1x32xf32> to vector<8x32xf32>
    %39 = arith.addf %36, %38 : vector<8x32xf32>
    %40 = vector.extract_strided_slice %34 {offsets = [0, 0], sizes = [8, 8], strides = [1, 1]} : vector<8x32xf32> to vector<8x8xf32>
    %41 = arith.truncf %40 : vector<8x8xf32> to vector<8x8xbf16>
    %c0_21 = arith.constant 0 : index
    %c0_22 = arith.constant 0 : index
    %c0_23 = arith.constant 0 : index
    %42 = vector.load %arg17[%c0_21, %c0_22, %c0_23] : memref<4x8x8xbf16, #tpu.memory_space<vmem>>, vector<1x8x8xbf16>
    %43 = vector.shape_cast %42 : vector<1x8x8xbf16> to vector<8x8xbf16>
    %44 = vector.shape_cast %41 : vector<8x8xbf16> to vector<1x8x8xbf16>
    tpu.vector_store %arg17[%c0_21, %c0_22, %c0_23], %44 {strides = array<i32>} : memref<4x8x8xbf16, #tpu.memory_space<vmem>>, vector<1x8x8xbf16>,
    %45 = vector.extract_strided_slice %39 {offsets = [0, 0], sizes = [8, 8], strides = [1, 1]} : vector<8x32xf32> to vector<8x8xf32>
    %46 = arith.truncf %45 : vector<8x8xf32> to vector<8x8xbf16>
    %c0_24 = arith.constant 0 : index
    %c0_25 = arith.constant 0 : index
    %c0_26 = arith.constant 0 : index
    %47 = vector.load %arg18[%c0_24, %c0_25, %c0_26] : memref<4x8x8xbf16, #tpu.memory_space<vmem>>, vector<1x8x8xbf16>
    %48 = vector.shape_cast %47 : vector<1x8x8xbf16> to vector<8x8xbf16>
    %49 = vector.shape_cast %46 : vector<8x8xbf16> to vector<1x8x8xbf16>
    tpu.vector_store %arg18[%c0_24, %c0_25, %c0_26], %49 {strides = array<i32>} : memref<4x8x8xbf16, #tpu.memory_space<vmem>>, vector<1x8x8xbf16>,
    %50 = vector.extract_strided_slice %34 {offsets = [0, 8], sizes = [8, 8], strides = [1, 1]} : vector<8x32xf32> to vector<8x8xf32>
    %51 = arith.truncf %50 : vector<8x8xf32> to vector<8x8xbf16>
    %c1 = arith.constant 1 : index
    %c0_27 = arith.constant 0 : index
    %c0_28 = arith.constant 0 : index
    %52 = vector.load %arg17[%c1, %c0_27, %c0_28] : memref<4x8x8xbf16, #tpu.memory_space<vmem>>, vector<1x8x8xbf16>
    %53 = vector.shape_cast %52 : vector<1x8x8xbf16> to vector<8x8xbf16>
    %54 = vector.shape_cast %51 : vector<8x8xbf16> to vector<1x8x8xbf16>
    tpu.vector_store %arg17[%c1, %c0_27, %c0_28], %54 {strides = array<i32>} : memref<4x8x8xbf16, #tpu.memory_space<vmem>>, vector<1x8x8xbf16>,
    %55 = vector.extract_strided_slice %39 {offsets = [0, 8], sizes = [8, 8], strides = [1, 1]} : vector<8x32xf32> to vector<8x8xf32>
    %56 = arith.truncf %55 : vector<8x8xf32> to vector<8x8xbf16>
    %c1_29 = arith.constant 1 : index
    %c0_30 = arith.constant 0 : index
    %c0_31 = arith.constant 0 : index
    %57 = vector.load %arg18[%c1_29, %c0_30, %c0_31] : memref<4x8x8xbf16, #tpu.memory_space<vmem>>, vector<1x8x8xbf16>
    %58 = vector.shape_cast %57 : vector<1x8x8xbf16> to vector<8x8xbf16>
    %59 = vector.shape_cast %56 : vector<8x8xbf16> to vector<1x8x8xbf16>
    tpu.vector_store %arg18[%c1_29, %c0_30, %c0_31], %59 {strides = array<i32>} : memref<4x8x8xbf16, #tpu.memory_space<vmem>>, vector<1x8x8xbf16>,
    %60 = vector.extract_strided_slice %34 {offsets = [0, 16], sizes = [8, 8], strides = [1, 1]} : vector<8x32xf32> to vector<8x8xf32>
    %61 = arith.truncf %60 : vector<8x8xf32> to vector<8x8xbf16>
    %c2 = arith.constant 2 : index
    %c0_32 = arith.constant 0 : index
    %c0_33 = arith.constant 0 : index
    %62 = vector.load %arg17[%c2, %c0_32, %c0_33] : memref<4x8x8xbf16, #tpu.memory_space<vmem>>, vector<1x8x8xbf16>
    %63 = vector.shape_cast %62 : vector<1x8x8xbf16> to vector<8x8xbf16>
    %64 = vector.shape_cast %61 : vector<8x8xbf16> to vector<1x8x8xbf16>
    tpu.vector_store %arg17[%c2, %c0_32, %c0_33], %64 {strides = array<i32>} : memref<4x8x8xbf16, #tpu.memory_space<vmem>>, vector<1x8x8xbf16>,
    %65 = vector.extract_strided_slice %39 {offsets = [0, 16], sizes = [8, 8], strides = [1, 1]} : vector<8x32xf32> to vector<8x8xf32>
    %66 = arith.truncf %65 : vector<8x8xf32> to vector<8x8xbf16>
    %c2_34 = arith.constant 2 : index
    %c0_35 = arith.constant 0 : index
    %c0_36 = arith.constant 0 : index
    %67 = vector.load %arg18[%c2_34, %c0_35, %c0_36] : memref<4x8x8xbf16, #tpu.memory_space<vmem>>, vector<1x8x8xbf16>
    %68 = vector.shape_cast %67 : vector<1x8x8xbf16> to vector<8x8xbf16>
    %69 = vector.shape_cast %66 : vector<8x8xbf16> to vector<1x8x8xbf16>
    tpu.vector_store %arg18[%c2_34, %c0_35, %c0_36], %69 {strides = array<i32>} : memref<4x8x8xbf16, #tpu.memory_space<vmem>>, vector<1x8x8xbf16>,
    %70 = vector.extract_strided_slice %34 {offsets = [0, 24], sizes = [8, 8], strides = [1, 1]} : vector<8x32xf32> to vector<8x8xf32>
    %71 = arith.truncf %70 : vector<8x8xf32> to vector<8x8xbf16>
    %c3 = arith.constant 3 : index
    %c0_37 = arith.constant 0 : index
    %c0_38 = arith.constant 0 : index
    %72 = vector.load %arg17[%c3, %c0_37, %c0_38] : memref<4x8x8xbf16, #tpu.memory_space<vmem>>, vector<1x8x8xbf16>
    %73 = vector.shape_cast %72 : vector<1x8x8xbf16> to vector<8x8xbf16>
    %74 = vector.shape_cast %71 : vector<8x8xbf16> to vector<1x8x8xbf16>
    tpu.vector_store %arg17[%c3, %c0_37, %c0_38], %74 {strides = array<i32>} : memref<4x8x8xbf16, #tpu.memory_space<vmem>>, vector<1x8x8xbf16>,
    %75 = vector.extract_strided_slice %39 {offsets = [0, 24], sizes = [8, 8], strides = [1, 1]} : vector<8x32xf32> to vector<8x8xf32>
    %76 = arith.truncf %75 : vector<8x8xf32> to vector<8x8xbf16>
    %c3_39 = arith.constant 3 : index
    %c0_40 = arith.constant 0 : index
    %c0_41 = arith.constant 0 : index
    %77 = vector.load %arg18[%c3_39, %c0_40, %c0_41] : memref<4x8x8xbf16, #tpu.memory_space<vmem>>, vector<1x8x8xbf16>
    %78 = vector.shape_cast %77 : vector<1x8x8xbf16> to vector<8x8xbf16>
    %79 = vector.shape_cast %76 : vector<8x8xbf16> to vector<1x8x8xbf16>
    tpu.vector_store %arg18[%c3_39, %c0_40, %c0_41], %79 {strides = array<i32>} : memref<4x8x8xbf16, #tpu.memory_space<vmem>>, vector<1x8x8xbf16>,
    %c0_42 = arith.constant 0 : index
    %c0_43 = arith.constant 0 : index
    %c0_44 = arith.constant 0 : index
    %80 = vector.load %arg16[%c0_42, %c0_43, %c0_44] : memref<4x8x8xbf16, #tpu.memory_space<vmem>>, vector<4x8x8xbf16>
    %c0_45 = arith.constant 0 : index
    %c0_46 = arith.constant 0 : index
    %c0_47 = arith.constant 0 : index
    %81 = vector.load %arg17[%c0_45, %c0_46, %c0_47] : memref<4x8x8xbf16, #tpu.memory_space<vmem>>, vector<4x8x8xbf16>
    "tpu.trace_start"() <{level = 10 : i32, message = "hqd,hkd->hqk"}> : () -> ()
    %cst_48 = arith.constant dense<0.000000e+00> : vector<4x8x8xf32>
    %82 = tpu.matmul %80, %81, %cst_48 {dimension_numbers = #tpu.dot_dimension_numbers<[2], [2], [1], [1], [0, 0, 0, 1, 1, 1], [0], [0]>} : vector<4x8x8xbf16>, vector<4x8x8xbf16>, vector<4x8x8xf32> -> vector<4x8x8xf32>
    "tpu.trace_stop"() : () -> ()
    %c0_49 = arith.constant 0 : index
    %c0_50 = arith.constant 0 : index
    %c0_51 = arith.constant 0 : index
    %83 = vector.load %arg19[%c0_49, %c0_50, %c0_51] : memref<4x8x1xf32, #tpu.memory_space<vmem>>, vector<4x8x1xf32>
    %cst_52 = arith.constant dense<0xFF800000> : vector<4x8xf32>
    %84 = vector.multi_reduction <maximumf>, %82, %cst_52 [2] : vector<4x8x8xf32> to vector<4x8xf32>
    %85 = vector.shape_cast %84 : vector<4x8xf32> to vector<4x8x1xf32>
    %86 = arith.maximumf %83, %85 : vector<4x8x1xf32>
    %87 = arith.subf %83, %86 : vector<4x8x1xf32>
    %88 = math.exp %87 : vector<4x8x1xf32>
    %89 = vector.broadcast %86 : vector<4x8x1xf32> to vector<4x8x8xf32>
    %90 = arith.subf %82, %89 : vector<4x8x8xf32>
    %91 = math.exp %90 : vector<4x8x8xf32>
    %c0_53 = arith.constant 0 : index
    %c0_54 = arith.constant 0 : index
    %c0_55 = arith.constant 0 : index
    %92 = vector.load %arg20[%c0_53, %c0_54, %c0_55] : memref<4x8x1xf32, #tpu.memory_space<vmem>>, vector<4x8x1xf32>
    %93 = arith.mulf %88, %92 : vector<4x8x1xf32>
    %cst_56 = arith.constant dense<0.000000e+00> : vector<4x8xf32>
    %94 = vector.multi_reduction <add>, %91, %cst_56 [2] : vector<4x8x8xf32> to vector<4x8xf32>
    %95 = vector.shape_cast %94 : vector<4x8xf32> to vector<4x8x1xf32>
    %96 = arith.addf %93, %95 : vector<4x8x1xf32>
    %c0_57 = arith.constant 0 : index
    %c0_58 = arith.constant 0 : index
    %c0_59 = arith.constant 0 : index
    %97 = vector.load %arg20[%c0_57, %c0_58, %c0_59] : memref<4x8x1xf32, #tpu.memory_space<vmem>>, vector<4x8x1xf32>
    tpu.vector_store %arg20[%c0_57, %c0_58, %c0_59], %96 {strides = array<i32>} : memref<4x8x1xf32, #tpu.memory_space<vmem>>, vector<4x8x1xf32>,
    %c0_60 = arith.constant 0 : index
    %c0_61 = arith.constant 0 : index
    %c0_62 = arith.constant 0 : index
    %98 = vector.load %arg21[%c0_60, %c0_61, %c0_62] : memref<4x8x8xf32, #tpu.memory_space<vmem>>, vector<4x8x8xf32>
    %99 = vector.broadcast %88 : vector<4x8x1xf32> to vector<4x8x8xf32>
    %100 = arith.mulf %99, %98 : vector<4x8x8xf32>
    %101 = arith.truncf %91 : vector<4x8x8xf32> to vector<4x8x8xbf16>
    %c0_63 = arith.constant 0 : index
    %c0_64 = arith.constant 0 : index
    %c0_65 = arith.constant 0 : index
    %102 = vector.load %arg18[%c0_63, %c0_64, %c0_65] : memref<4x8x8xbf16, #tpu.memory_space<vmem>>, vector<4x8x8xbf16>
    "tpu.trace_start"() <{level = 10 : i32, message = "hqk,hkd->hqd"}> : () -> ()
    %cst_66 = arith.constant dense<0.000000e+00> : vector<4x8x8xf32>
    %103 = tpu.matmul %101, %102, %cst_66 {dimension_numbers = #tpu.dot_dimension_numbers<[2], [1], [1], [2], [0, 0, 0, 1, 1, 2], [0], [0]>} : vector<4x8x8xbf16>, vector<4x8x8xbf16>, vector<4x8x8xf32> -> vector<4x8x8xf32>
    "tpu.trace_stop"() : () -> ()
    %104 = arith.addf %100, %103 : vector<4x8x8xf32>
    %c0_67 = arith.constant 0 : index
    %c0_68 = arith.constant 0 : index
    %c0_69 = arith.constant 0 : index
    %105 = vector.load %arg21[%c0_67, %c0_68, %c0_69] : memref<4x8x8xf32, #tpu.memory_space<vmem>>, vector<4x8x8xf32>
    tpu.vector_store %arg21[%c0_67, %c0_68, %c0_69], %104 {strides = array<i32>} : memref<4x8x8xf32, #tpu.memory_space<vmem>>, vector<4x8x8xf32>,
    %c0_70 = arith.constant 0 : index
    %c0_71 = arith.constant 0 : index
    %c0_72 = arith.constant 0 : index
    %106 = vector.load %arg19[%c0_70, %c0_71, %c0_72] : memref<4x8x1xf32, #tpu.memory_space<vmem>>, vector<4x8x1xf32>
    tpu.vector_store %arg19[%c0_70, %c0_71, %c0_72], %86 {strides = array<i32>} : memref<4x8x1xf32, #tpu.memory_space<vmem>>, vector<4x8x1xf32>,
    %c0_i32_73 = arith.constant 0 : i32
    %107 = arith.cmpi eq, %arg2, %c0_i32_73 : i32
    %108 = arith.extui %107 : i1 to i32
    %c0_i32_74 = arith.constant 0 : i32
    %109 = arith.cmpi ne, %108, %c0_i32_74 : i32
    scf.if %109 {
      %c0_75 = arith.constant 0 : index
      %c0_76 = arith.constant 0 : index
      %c0_77 = arith.constant 0 : index
      %110 = vector.load %arg21[%c0_75, %c0_76, %c0_77] : memref<4x8x8xf32, #tpu.memory_space<vmem>>, vector<4x8x8xf32>
      %c0_78 = arith.constant 0 : index
      %c0_79 = arith.constant 0 : index
      %c0_80 = arith.constant 0 : index
      %111 = vector.load %arg20[%c0_78, %c0_79, %c0_80] : memref<4x8x1xf32, #tpu.memory_space<vmem>>, vector<4x8x1xf32>
      %112 = tpu.reciprocal %111 {approx = true} : vector<4x8x1xf32> -> vector<4x8x1xf32>
      %113 = vector.broadcast %112 : vector<4x8x1xf32> to vector<4x8x8xf32>
      %114 = arith.mulf %110, %113 : vector<4x8x8xf32>
      %115 = vector.extract_strided_slice %114 {offsets = [0, 0, 0], sizes = [1, 8, 8], strides = [1, 1, 1]} : vector<4x8x8xf32> to vector<1x8x8xf32>
      %116 = vector.shape_cast %115 : vector<1x8x8xf32> to vector<8x8xf32>
      %117 = vector.extract_strided_slice %114 {offsets = [1, 0, 0], sizes = [1, 8, 8], strides = [1, 1, 1]} : vector<4x8x8xf32> to vector<1x8x8xf32>
      %118 = vector.shape_cast %117 : vector<1x8x8xf32> to vector<8x8xf32>
      %119 = vector.extract_strided_slice %114 {offsets = [2, 0, 0], sizes = [1, 8, 8], strides = [1, 1, 1]} : vector<4x8x8xf32> to vector<1x8x8xf32>
      %120 = vector.shape_cast %119 : vector<1x8x8xf32> to vector<8x8xf32>
      %121 = vector.extract_strided_slice %114 {offsets = [3, 0, 0], sizes = [1, 8, 8], strides = [1, 1, 1]} : vector<4x8x8xf32> to vector<1x8x8xf32>
      %122 = vector.shape_cast %121 : vector<1x8x8xf32> to vector<8x8xf32>
      %123 = tpu.concatenate %116, %118, %120, %122 in 1 : vector<8x8xf32>, vector<8x8xf32>, vector<8x8xf32>, vector<8x8xf32> -> vector<8x32xf32>
      %124 = arith.truncf %123 : vector<8x32xf32> to vector<8x32xbf16>
      %c0_81 = arith.constant 0 : index
      %c0_82 = arith.constant 0 : index
      %125 = vector.load %arg13[%c0_81, %c0_82] : memref<32x32xbf16, #tpu.memory_space<vmem>>, vector<32x32xbf16>
      %cst_83 = arith.constant dense<0.000000e+00> : vector<8x32xf32>
      %126 = tpu.matmul %124, %125, %cst_83 {dimension_numbers = #tpu.dot_dimension_numbers<[1], [0], [0], [1], [0, 0, 1, 1], [], []>} : vector<8x32xbf16>, vector<32x32xbf16>, vector<8x32xf32> -> vector<8x32xf32>
      %c0_84 = arith.constant 0 : index
      %c0_85 = arith.constant 0 : index
      %127 = vector.load %arg14[%c0_84, %c0_85] : memref<1x32xf32, #tpu.memory_space<vmem>>, vector<1x32xf32>
      %128 = vector.broadcast %127 : vector<1x32xf32> to vector<8x32xf32>
      %129 = arith.addf %126, %128 : vector<8x32xf32>
      %c0_86 = arith.constant 0 : index
      %c0_87 = arith.constant 0 : index
      %c0_88 = arith.constant 0 : index
      %130 = vector.load %arg15[%c0_86, %c0_87, %c0_88] : memref<1x8x32xf32, #tpu.memory_space<vmem>>, vector<1x8x32xf32>
      %131 = vector.shape_cast %130 : vector<1x8x32xf32> to vector<8x32xf32>
      %132 = vector.shape_cast %129 : vector<8x32xf32> to vector<1x8x32xf32>
      tpu.vector_store %arg15[%c0_86, %c0_87, %c0_88], %132 {strides = array<i32>} : memref<1x8x32xf32, #tpu.memory_space<vmem>>, vector<1x8x32xf32>,
    } else {
    }
    return
  }
  func.func @transform_0(%arg0: i32, %arg1: i32, %arg2: i32) -> (i32, i32, i32) {
    %c0_i32 = arith.constant 0 : i32
    %c0_i32_0 = arith.constant 0 : i32
    return %arg0, %arg1, %c0_i32 : i32, i32, i32
  }
  func.func @transform_1(%arg0: i32, %arg1: i32, %arg2: i32) -> (i32, i32, i32) {
    %c0_i32 = arith.constant 0 : i32
    %c0_i32_0 = arith.constant 0 : i32
    return %arg0, %arg2, %c0_i32 : i32, i32, i32
  }
  func.func @transform_2(%arg0: i32, %arg1: i32, %arg2: i32) -> (i32, i32) {
    %c0_i32 = arith.constant 0 : i32
    %c0_i32_0 = arith.constant 0 : i32
    %c0_i32_1 = arith.constant 0 : i32
    return %c0_i32, %c0_i32_0 : i32, i32
  }
  func.func @transform_3(%arg0: i32, %arg1: i32, %arg2: i32) -> (i32, i32) {
    %c0_i32 = arith.constant 0 : i32
    %c0_i32_0 = arith.constant 0 : i32
    %c0_i32_1 = arith.constant 0 : i32
    return %c0_i32, %c0_i32_0 : i32, i32
  }
  func.func @transform_4(%arg0: i32, %arg1: i32, %arg2: i32) -> (i32, i32) {
    %c0_i32 = arith.constant 0 : i32
    %c0_i32_0 = arith.constant 0 : i32
    %c0_i32_1 = arith.constant 0 : i32
    return %c0_i32, %c0_i32_0 : i32, i32
  }
  func.func @transform_5(%arg0: i32, %arg1: i32, %arg2: i32) -> (i32, i32) {
    %c0_i32 = arith.constant 0 : i32
    %c0_i32_0 = arith.constant 0 : i32
    %c0_i32_1 = arith.constant 0 : i32
    return %c0_i32, %c0_i32_0 : i32, i32
  }
  func.func @transform_6(%arg0: i32, %arg1: i32, %arg2: i32) -> (i32, i32) {
    %c0_i32 = arith.constant 0 : i32
    %c0_i32_0 = arith.constant 0 : i32
    %c0_i32_1 = arith.constant 0 : i32
    return %c0_i32, %c0_i32_0 : i32, i32
  }
  func.func @transform_7(%arg0: i32, %arg1: i32, %arg2: i32) -> (i32, i32) {
    %c0_i32 = arith.constant 0 : i32
    %c0_i32_0 = arith.constant 0 : i32
    %c0_i32_1 = arith.constant 0 : i32
    return %c0_i32, %c0_i32_0 : i32, i32
  }
  func.func @transform_8(%arg0: i32, %arg1: i32, %arg2: i32) -> (i32, i32) {
    %c0_i32 = arith.constant 0 : i32
    %c0_i32_0 = arith.constant 0 : i32
    %c0_i32_1 = arith.constant 0 : i32
    return %c0_i32, %c0_i32_0 : i32, i32
  }
  func.func @transform_9(%arg0: i32, %arg1: i32, %arg2: i32) -> (i32, i32) {
    %c0_i32 = arith.constant 0 : i32
    %c0_i32_0 = arith.constant 0 : i32
    %c0_i32_1 = arith.constant 0 : i32
    return %c0_i32, %c0_i32_0 : i32, i32
  }
  func.func @transform_10(%arg0: i32, %arg1: i32, %arg2: i32) -> (i32, i32) {
    %c0_i32 = arith.constant 0 : i32
    %c0_i32_0 = arith.constant 0 : i32
    %c0_i32_1 = arith.constant 0 : i32
    return %c0_i32, %c0_i32_0 : i32, i32
  }
  func.func @transform_11(%arg0: i32, %arg1: i32, %arg2: i32) -> (i32, i32) {
    %c0_i32 = arith.constant 0 : i32
    %c0_i32_0 = arith.constant 0 : i32
    %c0_i32_1 = arith.constant 0 : i32
    return %c0_i32, %c0_i32_0 : i32, i32
  }
  func.func @transform_12(%arg0: i32, %arg1: i32, %arg2: i32) -> (i32, i32, i32) {
    %c0_i32 = arith.constant 0 : i32
    %c0_i32_0 = arith.constant 0 : i32
    return %arg0, %arg1, %c0_i32 : i32, i32, i32
  }
}

</mosaic_0001>

<bundles_post_ra>
// kernel: tpu_custom_call.1
= control target key start
LH: loop header
LB: loop body
LE: loop exit
PB: predicated region body
PF: predicated region fallthrough
CT: control target
= control target key end

     0   :  { %s2311_s0 = inlined_call_operand.hbm [shape: f32[2,8,32], index: 0, kind: input, shape index: {}]   ;;  %s2312_s1 = inlined_call_operand.hbm [shape: f32[2,8,32], index: 1, kind: input, shape index: {}]   ;;  %s2313_s2 = inlined_call_operand.vmem [shape: f32[1,32], index: 2, kind: input, shape index: {}]   ;;  %s2314_s3 = inlined_call_operand.vmem [shape: f32[1,32], index: 3, kind: input, shape index: {}]   ;;  %s2315_s4 = inlined_call_operand.hbm [shape: bf16[32,32], index: 4, kind: input, shape index: {}]   ;;  %s2316_s5 = inlined_call_operand.hbm [shape: bf16[32,32], index: 5, kind: input, shape index: {}]   ;;  %s2317_s6 = inlined_call_operand.hbm [shape: bf16[32,32], index: 6, kind: input, shape index: {}]   ;;  %s2318_s7 = inlined_call_operand.vmem [shape: f32[1,32], index: 7, kind: input, shape index: {}]   ;;  %s2319_s8 = inlined_call_operand.vmem [shape: f32[1,32], index: 8, kind: input, shape index: {}]   ;;  %s2320_s9 = inlined_call_operand.vmem [shape: f32[1,32], index: 9, kind: input, shape index: {}]   ;;  %s2321_s10 = inlined_call_operand.hbm [shape: bf16[32,32], index: 10, kind: input, shape index: {}]   ;;  %s2322_s11 = inlined_call_operand.vmem [shape: f32[1,32], index: 11, kind: input, shape index: {}]   ;;  %s2323_s12 = inlined_call_operand.hbm [shape: f32[2,8,32], index: 12, kind: output, shape index: {}]  }
   0x1   :  { %2332 = sst [smem:[#allocation33_spill]] %s2315_s4 }
   0x2   :  { %2333 = sst [smem:[#allocation34_spill]] %s2316_s5 }
   0x3   :  { %2334 = sst [smem:[#allocation35_spill]] %s2317_s6 }
   0x4   :  { %2335 = sst [smem:[#allocation36_spill]] %s2321_s10 }
   0x5   :  { %2336 = sst [smem:[#allocation37_spill]] %s2322_s11 }
   0x6   :  { %2337 = sst [smem:[#allocation38_spill]] %s2323_s12 }
   0x7   :  { %17 = vsyncpa [#allocation9], 0 }
   0x8   :  { %19 = vsyncpa [#allocation9 + $0x1], 0 }
   0x9   :  { %20 = vsyncpa [#allocation12], 0 }
   0xa   :  { %22 = vsyncpa [#allocation12 + $0x1], 0 }
   0xb   :  { %23 = vsyncpa [#allocation15], 0 }
   0xc   :  { %24 = vsyncpa [#allocation18], 0 }
   0xd   :  { %25 = vsyncpa [#allocation10], 0 }
   0xe   :  { %27 = vsyncpa [#allocation10 + $0x1], 0  ;;  %s1981_s21 = smov 0   ;;  %s1983_s22 = smov 0  }
   0xf   :  { %s1985_s23 = smov 0   ;;  %s1987_s24 = smov 0  }
  0x10   :  { %s1989_s25 = smov 0   ;;  %s1991_s26 = smov 0  }
  0x11 LB: > { %2338 = sst [smem:[#allocation26_spill]] %s1878_s21  ;;  %s2012_s27 = sadd.s32 4294967295, %s1898_s26   ;;  %s1898_s26 = sphi %s1991_s26, %s33_s26   ;;  %s1894_s25 = sphi %s1989_s25, %s2363_s25   ;;  %s1890_s24 = sphi %s1987_s24, %s2362_s24   ;;  %s1886_s23 = sphi %s1985_s23, %s2361_s23   ;;  %s1882_s22 = sphi %s1983_s22, %s2365_s22   ;;  %s1878_s21 = sphi %s1981_s21, %s2364_s21  }
  0x12   : > { %2339 = sst [smem:[#allocation27_spill]] %s1886_s23  ;;  %p1387_p0 = scmp.ge.s32.totalorder %s1898_s26, 1 }
  0x13   : > { %2340 = sst [smem:[#allocation28_spill]] %s1894_s25  ;;  %p75_p1 = scmp.eq.s32.totalorder %s2012_s27, 0 }
  0x14   : > { %p351_p2 = scmp.lt.s32.totalorder %s1898_s26, 3  ;;  %s2341_s4 = sld [smem:[#allocation33_spill]] }
  0x15   : > { %s1900_s14 = smov [#allocation13]   ;;  %p1392_p6 = scmp.ge.s32.totalorder %s1898_s26, 2 }
  0x16   : > { %p2020_p3 = pnand %p1387_p0, %p351_p2  ;;  %s370_s15 = sshll.u32 %s1900_s14, 4  ;;  %s371_s15 = int_to_ptr.vmem [resolvable:$true] %s370_s15 }
  0x17   : > { %s2344_s5 = sld [smem:[#allocation34_spill]]  ;;  %s1901_s20 = smov 64  }
  0x18   : > { %p1483_p4 = pneg %p2020_p3  ;;  %s1902_s28 = smov 4  }
  0x19   : > { %s1903_s29 = smov [#allocation14]   ;;  %s2345_s6 = sld [smem:[#allocation35_spill]] }
  0x1a   : > { %s368_s30 = sshll.u32 %s2341_s4, 4  ;;  %p2028_p5 = pnand %p1483_p4, %p75_p1  ;;  %s369_s30 = int_to_ptr.hbm [resolvable:$true] %s368_s30 }
  0x1b   : > { %s384_s14 = sshll.u32 %s1903_s29, 4  ;;  %s2346_s10 = sld [smem:[#allocation36_spill]]  ;;  %s385_s14 = int_to_ptr.vmem [resolvable:$true] %s384_s14 }
  0x1c   : > { %1486 = dma.hbm_to_vmem [thread:$0]  (!%p2028_p5), %s369_s30, 256, %s371_s15, [#allocation12], %s1901_s20, %s1901_s20, %s1902_s28  }
  0x1d   : > { %s382_s19 = sshll.u32 %s2344_s5, 4  ;;  %s1904_s15 = smov [#allocation16]   ;;  %s383_s19 = int_to_ptr.hbm [resolvable:$true] %s382_s19 }
  0x1e   : > { %1489 = dma.hbm_to_vmem [thread:$0]  (!%p2028_p5), %s383_s19, 256, %s385_s14, [#allocation15], %s1901_s20, %s1901_s20, %s1902_s28  }
  0x1f   : > { %s396_s12 = sshll.u32 %s2345_s6, 4  ;;  %s398_s5 = sshll.u32 %s1904_s15, 4  ;;  %s397_s12 = int_to_ptr.hbm [resolvable:$true] %s396_s12  ;;  %s399_s5 = int_to_ptr.vmem [resolvable:$true] %s398_s5 }
  0x20   : > { %1492 = dma.hbm_to_vmem [thread:$0]  (!%p2028_p5), %s397_s12, 256, %s399_s5, [#allocation15], %s1901_s20, %s1901_s20, %s1902_s28  }
  0x21   : > { %s419_s30 = sshll.u32 %s2346_s10, 4  ;;  %s1905_s4 = smov [#allocation17]   ;;  %s420_s30 = int_to_ptr.hbm [resolvable:$true] %s419_s30 }
  0x22   : > { %s421_s11 = sshll.u32 %s1905_s4, 4  ;;  %s1386_s19 = sadd.s32 4294967294, %s1898_s26   ;;  %s422_s11 = int_to_ptr.vmem [resolvable:$true] %s421_s11 }
  0x23   : > { %1495 = dma.hbm_to_vmem [thread:$0]  (!%p2028_p5), %s420_s30, 256, %s422_s11, [#allocation18], %s1901_s20, %s1901_s20, %s1902_s28  }
  0x24   : > { %s52_s29 = sadd.s32 1, %s1894_s25  ;;  %s61_s14 = sadd.s32 1, %s1886_s23 }
  0x25   : > { %p54_p7 = scmp.ge.s32.totalorder %s52_s29, 2  ;;  %p68_p8 = scmp.ne.s32.totalorder %s1886_s23, %s1882_s22 }
  0x26   : > { %p69_p9 = scmp.eq.s32.totalorder %s1898_s26, 0  ;;  %p74_p11 = scmp.ne.s32.totalorder %s1882_s22, %s1878_s21 }
  0x27   : > { %s2367_s29 = smov (%p54_p7, %s52_s29), 0  ;;  %p338_p12 = scmp.eq.s32.totalorder %s2012_s27, 1 }
  0x28   : > { %2347 = sst [smem:[#allocation29_spill]] %s2367_s29  ;;  %p2058_p10 = por %p69_p9, %p68_p8 }
  0x29   : > { %s56_s12 = ssub.s32 %s1894_s25, %s2367_s29  ;;  %p2069_p0 = por %p75_p1, %p74_p11 }
  0x2a   : > { %p59_p13 = scmp.eq.s32.totalorder %s56_s12, 0  ;;  %p2073_p2 = por %p338_p12, %p68_p8 }
  0x2b   : > { %p344_p4 = scmp.eq.s32.totalorder %s1386_s19, 1  ;;  %p1511_p7 = scmp.lt.s32.totalorder %s1898_s26, 2 }
  0x2c   : > { %s2350_s20 = scalar_select %p2073_p2, 1, 0 }
  0x2d   : > { %s2078_s28 = scalar_select %p59_p13, %s1886_s23, %s61_s14  }
  0x2e   : > { %2351 = sst [smem:[#allocation30_spill]] %s2350_s20  ;;  %p2080_p5 = por %p344_p4, %p74_p11 }
  0x2f   : > { %2352 = sst [smem:[#allocation31_spill]] %s2078_s28  ;;  %s438_s18 = sand.u32 1, %s1886_s23  }
  0x30   : > { %s2353_s17 = scalar_select %p2080_p5, 1, 0 }
  0x31   : > { %s1394_s30 = sshll.u32 %s1894_s25, 3  ;;  %s1393_s15 = sshll.u32 %s438_s18, 3 }
  0x32   : > { %2354 = sst [smem:[#allocation32_spill]] %s2353_s17  ;;  %s447_s12 = scalar_lea.hbm %s2311_s0, %s1394_s30 }
  0x33   : > { %s449_s6 = sshll.u32 %s447_s12, 4  ;;  %s442_s10 = scalar_lea.vmem [#allocation8], %s1393_s15  ;;  %s450_s6 = int_to_ptr.hbm [resolvable:$true] %s449_s6 }
  0x34   : > { %s451_s29 = sshll.u32 %s442_s10, 4  ;;  %p1497_p8 = pnand %p1511_p7, %p2058_p10  ;;  %s452_s29 = int_to_ptr.vmem [resolvable:$true] %s451_s29 }
  0x35   : > { %s467_s28 = scalar_lea.hbm %s2312_s1, %s1394_s30  ;;  %s458_s17 = sand.u32 1, %s1898_s26  }
  0x36   : > { %s439_s21 = scalar_lea.sflag [#allocation9], %s438_s18  ;;  %s469_s25 = sshll.u32 %s467_s28, 4  ;;  %s470_s25 = int_to_ptr.hbm [resolvable:$true] %s469_s25 }
  0x37   : > { %1499 = dma.hbm_to_vmem [thread:$0]  (!%p1497_p8), %s450_s6, 128, %s452_s29, %s439_s21  }
  0x38   : > { %s462_s23 = scalar_lea.vmem [#allocation11], %s1393_s15  ;;  %s459_s4 = scalar_lea.sflag [#allocation12], %s458_s17 }
  0x39   : > { %s471_s20 = sshll.u32 %s462_s23, 4  ;;  %480 = sbr.rel (%p2020_p3) target bundleno = 1470 (0x5be), region = 68  ;;  %s472_s20 = int_to_ptr.vmem [resolvable:$true] %s471_s20 }
  0x3a   : > { %1502 = dma.hbm_to_vmem [thread:$0]  (!%p1497_p8), %s470_s25, 128, %s472_s20, %s459_s4  }
  0x3b   : > { %s2099_s10 = sand.u32 (!%p2020_p3), 1, %s1882_s22  }
  0x3c   : > { %s2102_s5 = sshll.u32 (!%p2020_p3), %s2099_s10, 3  ;;  %s483_s6 = scalar_lea.sflag (!%p2020_p3), [#allocation9], %s2099_s10 }
  0x3d   : > { %s486_s21 = scalar_lea.vmem (!%p2020_p3), [#allocation8], %s2102_s5 }
  0x3e   : > { %1853 = dma.done.wait (%p2069_p0), %s483_s6, 128  }
  0x3f   : > { %1855 = vsyncadd (%p2069_p0), %s483_s6, 4294967168  ;;  %s492_s23 = sand.u32 1, %s2012_s27   ;;  %s496_s13 = scalar_lea.vmem [#allocation11], %s2102_s5 }
  0x40   : > { %s493_s25 = scalar_lea.sflag [#allocation12], %s492_s23 }
  0x41   : > { %1857 = dma.done.wait (%p2069_p0), %s493_s25, 128  }
  0x42   : > { %1859 = vsyncadd (%p2069_p0), %s493_s25, 4294967168 }
  0x43   : > { %1861 = dma.done.wait (%p75_p1), [#allocation12], 256  }
  0x44   : > { %1863 = vsyncadd (%p75_p1), [#allocation12], 4294967040 }
  0x45   : > { %1865 = dma.done.wait (%p75_p1), [#allocation15], 512  }
  0x46   : > { %1867 = vsyncadd (%p75_p1), [#allocation15], 4294966784 }
  0x47   : > { %1869 = dma.done.wait (%p75_p1), [#allocation18], 256  }
  0x48   : > { %1871 = vsyncadd (%p75_p1), [#allocation18], 4294967040  ;;  %vm571_vm0 = vcmask 261120   ;;  %v680_v0 = vld [vmem:[%s496_s13] sm:$0xff]  ;;  %v570_v2 = vld [vmem:[%s486_s21] sm:$0xff]  ;;  %v1906_v4 = vmov 32.0  }
  0x49   : > { %v682_v1 = vsel %vm571_vm0, %v680_v0, 0.0  ;;  %v572_v3 = vsel %vm571_vm0, %v570_v2, 0.0  ;;  %1590 = vrcp.f32 %v1906_v4  ;;  %v1456_v21 = vld [vmem:[#allocation14 + $0x8] sm:$0xff]  ;;  %v1458_v22 = vld [vmem:[#allocation16 + $0x8] sm:$0xff]  ;;  %v1455_v23 = vld [vmem:[#allocation14] sm:$0xff]  ;;  %vm648_vm8 = vcmask 60416  }
  0x4a   : > { %683 = vadd.xlane.f32.xlu0 %v682_v1  ;;  %749 = vmatpush.bf16.msra.mxu1 %v1456_v21  ;;  %v1457_v24 = vld [vmem:[#allocation16] sm:$0xff]  ;;  %v1454_v25 = vld [vmem:[#allocation13 + $0x8] sm:$0xff]  ;;  %v1584_v41 = vld [vmem:[%s2313_s2] ss:$0 sm:$0xff]  ;;  %s1907_s15 = smov 112   ;;  %s1908_s11 = smov 120  }
  0x4b   : > { %782 = vmatpush.bf16.msra.mxu2 %v1458_v22  ;;  %639 = vmatpush.bf16.msra.mxu0 %v1454_v25  ;;  %v1453_v27 = vld [vmem:[#allocation13] sm:$0xff]  ;;  %v1585_v44 = vld [vmem:[%s2314_s3] ss:$0 sm:$0xff]  ;;  %s1909_s14 = smov 104   ;;  %vm675_vm9 = vcmask 64512   ;;  %vm1043_vm10 = vcmask 1043456  }
  0x4c   : > { %v1586_v57 = vld [vmem:[%s2319_s8] ss:$0 sm:$0xff]  ;;  %vm666_vm11 = vcmask 7168   ;;  %s1913_s4 = smov 8   ;;  %s1914_s6 = smov 24   ;;  %vm1181_vm12 = vcmask 130048  }
  0x4d   : > { %v1587_v61 = vld [vmem:[%s2320_s9] ss:$0 sm:$0xff]  ;;  %s1915_s21 = smov 16   ;;  %vm1183_vm13 = vcmask 195584   ;;  %s1450_s23 = sshll.u32 %s1890_s24, 3 }
  0x4e   : > { %750 = vmatpush.bf16.msra.mxu1 %v1455_v23  ;;  %v1588_v62 = vld [vmem:[%s2318_s7] ss:$0 sm:$0xff]  ;;  %s2355_s27 = sld [smem:[#allocation38_spill]]  ;;  %s562_s18 = scalar_lea.vmem [#allocation19], %s2102_s5 }
  0x4f   : > { %v1591_v5 = vpop.eup %1590  ;;  %783 = vmatpush.bf16.msra.mxu2 %v1457_v24  ;;  %640 = vmatpush.bf16.msra.mxu0 %v1453_v27  ;;  %s2357_s17 = sld [smem:[#allocation37_spill]]  ;;  %s1237_s30 = sshll.u32 %s562_s18, 4  ;;  %s1238_s30 = int_to_ptr.vmem [resolvable:$true] %s1237_s30 }
  0x50   : > { %v576_v6 = vmul.f32 32.0, %v1591_v5  ;;  %vm580_vm1 = vweird.f32 %v1591_v5 }
  0x52   : > { %573 = vadd.xlane.f32.xlu0 %v572_v3  ;;  %v577_v7 = vsub.f32 1.0, %v576_v6 }
  0x54   : > { %v578_v8 = vmul.f32 %v1591_v5, %v577_v7  ;;  %s1235_s16 = scalar_lea.hbm %s2355_s27, %s1450_s23  ;;  %s1820_s5 = scalar_lea.hbm %s2355_s27, 16 }
  0x56   : > { %v579_v9 = vadd.f32 %v1591_v5, %v578_v8 }
  0x58   : > { %v581_v10 = vsel %vm580_vm1, %v1591_v5, %v579_v9 }
  0xbd   : > { %v684_v11 = vpop.xlane.xlu0 %683 }
  0xbe   : > { %v692_v12 = vmul.f32 %v684_v11, %v581_v10 }
  0xc0   : > { %v693_v13 = vsub.f32 %v680_v0, %v692_v12 }
  0xc2   : > { %v694_v14 = vmul.f32 %v693_v13, %v693_v13 }
  0xc4   : > { %v695_v15 = vsel %vm571_vm0, %v694_v14, 0.0 }
  0xc5   : > { %696 = vadd.xlane.f32.xlu1 %v695_v15  ;;  %v574_v16 = vpop.xlane.xlu0 %573 }
  0xc6   : > { %v582_v17 = vmul.f32 %v581_v10, %v574_v16 }
  0xc8   : > { %v583_v18 = vsub.f32 %v570_v2, %v582_v17 }
  0xca   : > { %v584_v19 = vmul.f32 %v583_v18, %v583_v18 }
  0xcc   : > { %v585_v20 = vsel %vm571_vm0, %v584_v19, 0.0 }
  0xcd   : > { %586 = vadd.xlane.f32.xlu1 %v585_v20 }
 0x138   : > { %v697_v26 = vpop.xlane.xlu1 %696 }
 0x139   : > { %v698_v28 = vmul.f32 %v697_v26, %v581_v10 }
 0x13b   : > { %v699_v29 = vadd.f32 1e-05, %v698_v28 }
 0x13d   : > { %1592 = vrsqrt.f32 %v699_v29  ;;  %vm706_vm3 = vweird.f32 %v699_v29 }
 0x140   : > { %v587_v30 = vpop.xlane.xlu1 %586 }
 0x141   : > { %v588_v31 = vmul.f32 %v587_v30, %v581_v10 }
 0x143   : > { %v1593_v32 = vpop.eup %1592  ;;  %v589_v33 = vadd.f32 1e-05, %v588_v31 }
 0x144   : > { %v701_v34 = vmul.f32 %v1593_v32, %v699_v29  ;;  %vm707_vm2 = vweird.f32 %v1593_v32 }
 0x145   : > { %1594 = vrsqrt.f32 %v589_v33  ;;  %vm708_vm4 = vmor %vm706_vm3, %vm707_vm2  ;;  %vm596_vm6 = vweird.f32 %v589_v33 }
 0x146   : > { %v702_v35 = vmul.f32 %v1593_v32, %v701_v34 }
 0x148   : > { %v703_v36 = vmul.f32 0.5, %v702_v35  ;;  %v1911_v35 = vmov 0.0  }
 0x149   : > { %674 = vst.msk [vmem:[#allocation6 + $0x18] sm:$0xff] %vm666_vm11, %v1911_v35 }
 0x14a   : > { %v704_v37 = vsub.f32 1.5, %v703_v36  ;;  %671 = vst.msk [vmem:[#allocation6] sm:$0xff] %vm666_vm11, %v1911_v35 }
 0x14b   : > { %v1595_v38 = vpop.eup %1594  ;;  %672 = vst.msk [vmem:[#allocation6 + $0x8] sm:$0xff] %vm666_vm11, %v1911_v35 }
 0x14c   : > { %v705_v39 = vmul.f32 %v1593_v32, %v704_v37  ;;  %v591_v40 = vmul.f32 %v1595_v38, %v589_v33  ;;  %vm597_vm5 = vweird.f32 %v1595_v38  ;;  %673 = vst.msk [vmem:[#allocation6 + $0x10] sm:$0xff] %vm666_vm11, %v1911_v35 }
 0x14d   : > { %vm598_vm7 = vmor %vm596_vm6, %vm597_vm5  ;;  %676 = vst.msk [vmem:[#allocation7] sm:$0xff] %vm675_vm9, %v1911_v35 }
 0x14e   : > { %v709_v42 = vsel %vm708_vm4, %v1593_v32, %v705_v39  ;;  %v592_v43 = vmul.f32 %v1595_v38, %v591_v40  ;;  %v1910_v32 = vmov -inf   ;;  %677 = vst.msk [vmem:[#allocation7 + $0x8] sm:$0xff] %vm675_vm9, %v1911_v35 }
 0x14f   : > { %v710_v45 = vmul.f32 %v709_v42, %v693_v13  ;;  %667 = vst.msk [vmem:[#allocation5] sm:$0xff] %vm666_vm11, %v1910_v32 }
 0x150   : > { %v593_v46 = vmul.f32 0.5, %v592_v43  ;;  %668 = vst.msk [vmem:[#allocation5 + $0x8] sm:$0xff] %vm666_vm11, %v1910_v32 }
 0x151   : > { %v714_v47 = vmul.f32 %v1584_v41, %v710_v45  ;;  %669 = vst.msk [vmem:[#allocation5 + $0x10] sm:$0xff] %vm666_vm11, %v1910_v32 }
 0x152   : > { %v594_v48 = vsub.f32 1.5, %v593_v46  ;;  %670 = vst.msk [vmem:[#allocation5 + $0x18] sm:$0xff] %vm666_vm11, %v1910_v32  ;;  %v1912_v46 = vmov 0  }
 0x153   : > { %v718_v49 = vadd.f32 %v1585_v44, %v714_v47  ;;  %678 = vst.msk [vmem:[#allocation7 + $0x10] sm:$0xff] %vm675_vm9, %v1911_v35  ;;  %1581 = vset.pattern.permute.xlu0 %v1912_v46  ;;  %1582 = vset.pattern.permute.xlu1 %v1912_v46 }
 0x154   : > { %v595_v50 = vmul.f32 %v1595_v38, %v594_v48  ;;  %679 = vst.msk [vmem:[#allocation7 + $0x18] sm:$0xff] %vm675_vm9, %v1911_v35  ;;  %1583 = vset.pattern.permute.xlu2 %v1912_v46 }
 0x155   : > { %v719_v51 = vpack.c.bf16 %v718_v49, %v718_v49 }
 0x156   : > { %v599_v52 = vsel %vm598_vm7, %v1595_v38, %v595_v50  ;;  %v2205_v42 = vld [vmem:[#allocation5] sm:$0xff] }
 0x157   : > { %1422 = vmatmul.msk.bf16.vlgmr.msra.gmra.mxu1 %vm571_vm0, %v719_v51  ;;  %1431 = vmatmul.msk.bf16.vlgmr.msra.gmra.mxu2 %vm571_vm0, %v719_v51  ;;  %v600_v53 = vmul.f32 %v599_v52, %v583_v18 }
 0x158   : > { %v913_v52 = vld [vmem:[#allocation5 + $0x10] sm:$0xff] }
 0x159   : > { %v604_v54 = vmul.f32 %v1584_v41, %v600_v53  ;;  %v2218_v47 = vld [vmem:[#allocation5 + $0x18] sm:$0xff]  ;;  %v2229_v53 = vld [vmem:[#allocation5 + $0x8] sm:$0xff] }
 0x15b   : > { %v608_v55 = vadd.f32 %v1585_v44, %v604_v54 }
 0x15d   : > { %v609_v56 = vpack.c.bf16 %v608_v55, %v608_v55 }
 0x15f   : > { %1413 = vmatmul.msk.bf16.vlgmr.msra.gmra.mxu0 %vm571_vm0, %v609_v56 }
 0x1d4   : > { %v752_v58 = vpop.f32.mrf.mxu1 }
 0x1d5   : > { %v753_v59 = vadd.f32 %v1586_v57, %v752_v58 }
 0x1d7   : > { %v789_v60 = vpack.c.bf16 %v753_v59, %v753_v59 }
 0x1d9   : > { %791 = vst.msk [vmem:[#allocation3] sm:$0xf] %vm648_vm8, %v789_v60  ;;  %806 = vrot.lane.b32.xlu1 %v789_v60, %s1907_s15  ;;  %795 = vrot.lane.b32.xlu0 %v789_v60, %s1908_s11 }
 0x1da   : > { %816 = vrot.lane.b32.xlu2 %v789_v60, %s1909_s14  ;;  %v785_v63 = vpop.f32.mrf.mxu2 }
 0x1db   : > { %v786_v0 = vadd.f32 %v1587_v61, %v785_v63 }
 0x1dc   : > { %v642_v1 = vpop.f32.mrf.mxu0  ;;  %v754_v2 = vpop.f32.mrf.mxu1 }
 0x1dd   : > { %v2154_v3 = vpack.c.bf16 %v786_v0, %v786_v0  ;;  %v643_v4 = vadd.f32 %v1588_v62, %v642_v1 }
 0x1df   : > { %793 = vst.msk [vmem:[#allocation4] sm:$0xf] %vm648_vm8, %v2154_v3  ;;  %v646_v5 = vmul.f32 0.35355338, %v643_v4 }
 0x1e0   : > { %v830_v6 = vld [vmem:[#allocation3] sm:$0xf] }
 0x1e1   : > { %v647_v7 = vpack.c.bf16 %v646_v5, %v646_v5  ;;  %v839_v8 = vsel %vm675_vm9, %v830_v6, 0 }
 0x1e2   : > { %v787_v9 = vpop.f32.mrf.mxu2  ;;  %848 = vmatpush.bf16.xpose.msra.mxu3 %v839_v8 }
 0x1e3   : > { %649 = vst.msk [vmem:[#allocation2] sm:$0xf] %vm648_vm8, %v647_v7  ;;  %661 = vrot.lane.b32.xlu2 %v647_v7, %s1909_s14 }
 0x1e4   : > { %v644_v10 = vpop.f32.mrf.mxu0 }
 0x1e6   : > { %v1036_v11 = vld [vmem:[#allocation4] sm:$0xf] }
 0x1e7   : > { %v1045_v12 = vsel %vm1043_vm10, %v1036_v11, 0 }
 0x1ea   : > { %1054 = vmatpush.bf16.msrb.mxu3 %v1045_v12  ;;  %v826_v13 = vld [vmem:[#allocation2] sm:$0xf] }
 0x1eb   : > { %651 = vrot.lane.b32.xlu2 %v647_v7, %s1908_s11  ;;  %1432 = vmatmul.msk.bf16.vlgmr.msra.gmra.mxu3 %vm675_vm9, %v826_v13 }
 0x1f3   : > { %656 = vrot.lane.b32.xlu2 %v647_v7, %s1907_s15 }
 0x234   : > { %v817_v14 = vpop.permute.xlu2 %816 }
 0x235   : > { %820 = vst.msk [vmem:[#allocation3 + $0xc] sm:$0xf] %vm648_vm8, %v817_v14 }
 0x23c   : > { %v833_v15 = vld [vmem:[#allocation3 + $0xc] sm:$0xf] }
 0x23d   : > { %v896_v16 = vsel %vm675_vm9, %v833_v15, 0  ;;  %v662_v17 = vpop.permute.xlu2 %661 }
 0x23e   : > { %905 = vmatpush.bf16.xpose.msrb.mxu2 %v896_v16  ;;  %665 = vst.msk [vmem:[#allocation2 + $0xc] sm:$0xf] %vm648_vm8, %v662_v17 }
 0x245   : > { %v652_v18 = vpop.permute.xlu2 %651  ;;  %v829_v19 = vld [vmem:[#allocation2 + $0xc] sm:$0xf] }
 0x246   : > { %655 = vst.msk [vmem:[#allocation2 + $0x4] sm:$0xf] %vm648_vm8, %v652_v18  ;;  %1435 = vmatmul.msk.bf16.vlgmr.msrb.gmra.mxu2 %vm675_vm9, %v829_v19 }
 0x24b   : > { %v807_v20 = vpop.permute.xlu1 %806  ;;  %v796_v21 = vpop.permute.xlu0 %795 }
 0x24c   : > { %810 = vst.msk [vmem:[#allocation3 + $0x8] sm:$0xf] %vm648_vm8, %v807_v20 }
 0x24d   : > { %799 = vst.msk [vmem:[#allocation3 + $0x4] sm:$0xf] %vm648_vm8, %v796_v21  ;;  %v657_v22 = vpop.permute.xlu2 %656  ;;  %v827_v28 = vld [vmem:[#allocation2 + $0x4] sm:$0xf] }
 0x24e   : > { %660 = vst.msk [vmem:[#allocation2 + $0x8] sm:$0xf] %vm648_vm8, %v657_v22 }
 0x253   : > { %v832_v23 = vld [vmem:[#allocation3 + $0x8] sm:$0xf] }
 0x254   : > { %v831_v24 = vld [vmem:[#allocation3 + $0x4] sm:$0xf]  ;;  %v877_v25 = vsel %vm675_vm9, %v832_v23, 0 }
 0x255   : > { %v858_v26 = vsel %vm675_vm9, %v831_v24, 0  ;;  %886 = vmatpush.bf16.xpose.msrb.mxu1 %v877_v25  ;;  %v828_v27 = vld [vmem:[#allocation2 + $0x8] sm:$0xf] }
 0x256   : > { %867 = vmatpush.bf16.xpose.msrb.mxu0 %v858_v26 }
 0x25c   : > { %1434 = vmatmul.msk.bf16.vlgmr.msrb.gmra.mxu1 %vm675_vm9, %v828_v27 }
 0x25d   : > { %1433 = vmatmul.msk.bf16.vlgmr.msrb.gmra.mxu0 %vm675_vm9, %v827_v28 }
 0x26e   : > { %v2177_v29 = vpop.f32.mrf.mxu3 }
 0x26f   : > { %v915_v30 = vsel %vm675_vm9, %v2177_v29, -inf }
 0x270   : > { %916 = vmax.xlane.f32.xlu2 %v915_v30 }
 0x276   : > { %v852_v31 = vpop.f32.mrf.mxu3 }
 0x2c9   : > { %v2185_v33 = vpop.f32.mrf.mxu2 }
 0x2ca   : > { %v924_v34 = vsel %vm675_vm9, %v2185_v33, -inf }
 0x2cb   : > { %925 = vmax.xlane.f32.xlu2 %v924_v34  ;;  %v978_v34 = vld [vmem:[#allocation6 + $0x18] sm:$0xff] }
 0x2d1   : > { %v909_v36 = vpop.f32.mrf.mxu2 }
 0x2d9   : > { %v2197_v37 = vpop.f32.mrf.mxu1 }
 0x2da   : > { %v2199_v38 = vpop.f32.mrf.mxu0  ;;  %v921_v39 = vsel %vm675_vm9, %v2197_v37, -inf }
 0x2db   : > { %v918_v40 = vsel %vm675_vm9, %v2199_v38, -inf  ;;  %922 = vmax.xlane.f32.xlu1 %v921_v39  ;;  %v976_v39 = vld [vmem:[#allocation6 + $0x8] sm:$0xff] }
 0x2dc   : > { %919 = vmax.xlane.f32.xlu0 %v918_v40 }
 0x2e1   : > { %v890_v41 = vpop.f32.mrf.mxu1 }
 0x2e2   : > { %v871_v43 = vpop.f32.mrf.mxu0 }
 0x2e3   : > { %821 = vrot.lane.b32.xlu2 %v2154_v3, %s1909_s14  ;;  %v917_v44 = vpop.xlane.xlu2 %916 }
 0x2e4   : > { %v2210_v45 = vmax.f32 %v2205_v42, %v917_v44 }
 0x2e6   : > { %1125 = vst.msk [vmem:[#allocation5] sm:$0xff] %vm666_vm11, %v2210_v45  ;;  %v931_v40 = vsub.f32 %v2205_v42, %v2210_v45 }
 0x2eb   : > { %801 = vrot.lane.b32.xlu2 %v2154_v3, %s1908_s11  ;;  %s1224_s11 = scalar_lea.sflag [#allocation10], %s2099_s10 }
 0x2f3   : > { %811 = vrot.lane.b32.xlu2 %v2154_v3, %s1907_s15  ;;  %s1239_s15 = sshll.u32 %s1235_s16, 4  ;;  %s1240_s15 = int_to_ptr.hbm [resolvable:$true] %s1239_s15 }
 0x2f4   : > { %s1814_s24 = sshra.s32 %s1240_s15, 4  ;;  %s1815_s24 = int_to_ptr.hbm [resolvable:$true] %s1814_s24 }
 0x2f5   : > { %s1816_s12 = scalar_lea.hbm %s1815_s24, 8  ;;  %p1821_p10 = scmp.lt.s32.totalorder %s1815_s24, %s2355_s27 }
 0x2f6   : > { %p1817_p1 = scmp.ne.s32.totalorder %s1815_s24, %s1816_s12  ;;  %p1822_p11 = scmp.lt.s32.totalorder %s1820_s5, %s1816_s12 }
 0x2f8   : > { %p1818_p3 = pnand %p1817_p1, %p2073_p2  ;;  %p1823_p12 = por %p1822_p11, %p1821_p10 }
 0x2fa   : > { %p1819_p9 = pneg %p1818_p3 }
 0x2fc   : > { %p1824_p13 = pnand %p1823_p12, %p1819_p9 }
 0x33e   : > { %v926_v48 = vpop.xlane.xlu2 %925 }
 0x33f   : > { %v2221_v49 = vmax.f32 %v2218_v47, %v926_v48  ;;  %v935_v48 = vmul.f32 1.442695, %v931_v40 }
 0x341   : > { %v934_v50 = vsub.f32 %v2218_v47, %v2221_v49  ;;  %1128 = vst.msk [vmem:[#allocation5 + $0x18] sm:$0xff] %vm666_vm11, %v2221_v49  ;;  %960 = vperm.xlu0 %1581, %v2221_v49   ;;  %v977_v49 = vld [vmem:[#allocation6 + $0x10] sm:$0xff] }
 0x346   : > { %v822_v51 = vpop.permute.xlu2 %821 }
 0x347   : > { %825 = vst.msk [vmem:[#allocation4 + $0xc] sm:$0xf] %vm648_vm8, %v822_v51 }
 0x34e   : > { %v923_v54 = vpop.xlane.xlu1 %922  ;;  %v802_v55 = vpop.permute.xlu2 %801  ;;  %v1039_v56 = vld [vmem:[#allocation4 + $0xc] sm:$0xf] }
 0x34f   : > { %v920_v57 = vpop.xlane.xlu0 %919  ;;  %v929_v58 = vmax.f32 %v913_v52, %v923_v54  ;;  %805 = vst.msk [vmem:[#allocation4 + $0x4] sm:$0xf] %vm648_vm8, %v802_v55  ;;  %v1102_v59 = vsel %vm1043_vm10, %v1039_v56, 0  ;;  %v1005_v56 = vld [vmem:[#allocation7 + $0x8] sm:$0xff] }
 0x350   : > { %v928_v60 = vmax.f32 %v2229_v53, %v920_v57  ;;  %1111 = vmatpush.bf16.msra.mxu2 %v1102_v59  ;;  %v1006_v57 = vld [vmem:[#allocation7 + $0x10] sm:$0xff] }
 0x351   : > { %v933_v61 = vsub.f32 %v913_v52, %v929_v58  ;;  %1127 = vst.msk [vmem:[#allocation5 + $0x10] sm:$0xff] %vm666_vm11, %v929_v58 }
 0x352   : > { %v932_v62 = vsub.f32 %v2229_v53, %v928_v60  ;;  %1126 = vst.msk [vmem:[#allocation5 + $0x8] sm:$0xff] %vm666_vm11, %v928_v60  ;;  %950 = vperm.xlu1 %1582, %v928_v60  }
 0x353   : > { %v939_v15 = vmul.f32 1.442695, %v933_v61 }
 0x354   : > { %v937_v31 = vmul.f32 1.442695, %v932_v62 }
 0x356   : > { %v812_v63 = vpop.permute.xlu2 %811  ;;  %v1037_v0 = vld [vmem:[#allocation4 + $0x4] sm:$0xf] }
 0x357   : > { %815 = vst.msk [vmem:[#allocation4 + $0x8] sm:$0xf] %vm648_vm8, %v812_v63  ;;  %v1064_v1 = vsel %vm1043_vm10, %v1037_v0, 0 }
 0x358   : > { %1073 = vmatpush.bf16.msra.mxu0 %v1064_v1 }
 0x35a   : > { %955 = vperm.xlu1 %1582, %v929_v58  }
 0x35e   : > { %v1038_v2 = vld [vmem:[#allocation4 + $0x8] sm:$0xf] }
 0x35f   : > { %v1083_v3 = vsel %vm1043_vm10, %v1038_v2, 0 }
 0x360   : > { %1092 = vmatpush.bf16.msra.mxu1 %v1083_v3 }
 0x362   : > { %945 = vperm.xlu1 %1582, %v2210_v45   ;;  %v975_v45 = vld [vmem:[#allocation6] sm:$0xff] }
 0x3b3   : > { %v961_v4 = vpop.permute.xlu0 %960 }
 0x3b4   : > { %v966_v5 = vsub.f32 %v2185_v33, %v961_v4 }
 0x3b6   : > { %v973_v6 = vmul.f32 1.442695, %v966_v5 }
 0x3b8   : > { %1596 = vpow2.f32 %v973_v6 }
 0x3be   : > { %v1597_v7 = vpop.eup %1596 }
 0x3bf   : > { %v1035_v8 = vpack.c.bf16 %v1597_v7, %v1597_v7  ;;  %v992_v9 = vsel %vm675_vm9, %v1597_v7, 0.0 }
 0x3c0   : > { %993 = vadd.xlane.f32.xlu1 %v992_v9 }
 0x3c1   : > { %1439 = vmatmul.msk.bf16.vlgmr.msra.gmra.mxu2 %vm675_vm9, %v1035_v8 }
 0x3c4   : > { %v951_v10 = vpop.permute.xlu1 %950 }
 0x3c5   : > { %v964_v11 = vsub.f32 %v2199_v38, %v951_v10 }
 0x3c7   : > { %v969_v12 = vmul.f32 1.442695, %v964_v11 }
 0x3c9   : > { %1598 = vpow2.f32 %v969_v12  ;;  %v1007_v12 = vld [vmem:[#allocation7 + $0x18] sm:$0xff] }
 0x3cc   : > { %v956_v13 = vpop.permute.xlu1 %955 }
 0x3cd   : > { %v965_v14 = vsub.f32 %v2197_v37, %v956_v13 }
 0x3cf   : > { %v1599_v16 = vpop.eup %1598  ;;  %v971_v17 = vmul.f32 1.442695, %v965_v14 }
 0x3d0   : > { %v1033_v18 = vpack.c.bf16 %v1599_v16, %v1599_v16  ;;  %v986_v19 = vsel %vm675_vm9, %v1599_v16, 0.0 }
 0x3d1   : > { %1600 = vpow2.f32 %v971_v17  ;;  %987 = vadd.xlane.f32.xlu0 %v986_v19 }
 0x3d2   : > { %1602 = vpow2.f32 %v939_v15  ;;  %1437 = vmatmul.msk.bf16.vlgmr.msra.gmra.mxu0 %vm675_vm9, %v1033_v18 }
 0x3d4   : > { %v946_v20 = vpop.permute.xlu1 %945 }
 0x3d5   : > { %v963_v21 = vsub.f32 %v2177_v29, %v946_v20  ;;  %v941_v29 = vmul.f32 1.442695, %v934_v50  ;;  %v1004_v20 = vld [vmem:[#allocation7] sm:$0xff] }
 0x3d7   : > { %v1601_v22 = vpop.eup %1600  ;;  %v967_v23 = vmul.f32 1.442695, %v963_v21 }
 0x3d8   : > { %v1603_v24 = vpop.eup %1602  ;;  %v1034_v25 = vpack.c.bf16 %v1601_v22, %v1601_v22  ;;  %v989_v26 = vsel %vm675_vm9, %v1601_v22, 0.0 }
 0x3d9   : > { %1604 = vpow2.f32 %v967_v23  ;;  %990 = vadd.xlane.f32.xlu2 %v989_v26  ;;  %1020 = vperm.xlu1 %1582, %v1603_v24   ;;  %v981_v50 = vmul.f32 %v1603_v24, %v977_v49 }
 0x3da   : > { %1438 = vmatmul.msk.bf16.vlgmr.msra.gmra.mxu1 %vm675_vm9, %v1034_v25  ;;  %1606 = vpow2.f32 %v937_v31  ;;  %v1460_v31 = vld [vmem:[#allocation17 + $0x8] sm:$0xff] }
 0x3db   : > { %1608 = vpow2.f32 %v941_v29  ;;  %1215 = vmatpush.bf16.msra.mxu3 %v1460_v31  ;;  %v1459_v29 = vld [vmem:[#allocation17] sm:$0xff] }
 0x3df   : > { %v1605_v27 = vpop.eup %1604  ;;  %1216 = vmatpush.bf16.msra.mxu3 %v1459_v29 }
 0x3e0   : > { %v983_v28 = vsel %vm675_vm9, %v1605_v27, 0.0  ;;  %v1032_v30 = vpack.c.bf16 %v1605_v27, %v1605_v27  ;;  %v1607_v32 = vpop.eup %1606 }
 0x3e1   : > { %984 = vadd.xlane.f32.xlu0 %v983_v28  ;;  %v1609_v33 = vpop.eup %1608  ;;  %v980_v41 = vmul.f32 %v1607_v32, %v976_v39 }
 0x3e2   : > { %1436 = vmatmul.msk.bf16.vlgmr.msrb.gmra.mxu3 %vm675_vm9, %v1032_v30  ;;  %v982_v35 = vmul.f32 %v1609_v33, %v978_v34 }
 0x3f1   : > { %1015 = vperm.xlu2 %1583, %v1607_v32  }
 0x3f5   : > { %1025 = vperm.xlu0 %1581, %v1609_v33  }
 0x433   : > { %v994_v36 = vpop.xlane.xlu1 %993 }
 0x434   : > { %v998_v37 = vadd.f32 %v994_v36, %v982_v35 }
 0x436   : > { %1003 = vst.msk [vmem:[#allocation6 + $0x18] sm:$0xff] %vm666_vm11, %v998_v37 }
 0x43d   : > { %v1139_v38 = vld [vmem:[#allocation6 + $0x18] sm:$0xff] }
 0x43e   : > { %1610 = vrcp.f32 %v1139_v38 }
 0x43f   : > { %1612 = vpow2.f32 %v935_v48 }
 0x444   : > { %v1611_v43 = vpop.eup %1610  ;;  %v988_v44 = vpop.xlane.xlu0 %987 }
 0x445   : > { %v1113_v46 = vpop.f32.mrf.mxu2  ;;  %v996_v47 = vadd.f32 %v988_v44, %v980_v41  ;;  %1161 = vperm.xlu1 %1582, %v1611_v43   ;;  %v1613_v42 = vpop.eup %1612  ;;  %v1589_v43 = vld [vmem:[%s2357_s17] ss:$0 sm:$0xff] }
 0x446   : > { %v979_v59 = vmul.f32 %v1613_v42, %v975_v45 }
 0x447   : > { %1001 = vst.msk [vmem:[#allocation6 + $0x8] sm:$0xff] %vm666_vm11, %v996_v47 }
 0x44b   : > { %v1021_v58 = vpop.permute.xlu1 %1020 }
 0x44c   : > { %v991_v51 = vpop.xlane.xlu2 %990  ;;  %v1030_v1 = vmul.f32 %v1021_v58, %v1006_v57 }
 0x44d   : > { %v1115_v52 = vpop.f32.mrf.mxu2  ;;  %v997_v53 = vadd.f32 %v991_v51, %v981_v50 }
 0x44e   : > { %v1137_v54 = vld [vmem:[#allocation6 + $0x8] sm:$0xff] }
 0x44f   : > { %1002 = vst.msk [vmem:[#allocation6 + $0x10] sm:$0xff] %vm666_vm11, %v997_v53  ;;  %v1075_v55 = vpop.f32.mrf.mxu0  ;;  %1614 = vrcp.f32 %v1137_v54 }
 0x454   : > { %v985_v60 = vpop.xlane.xlu0 %984  ;;  %v1016_v61 = vpop.permute.xlu2 %1015 }
 0x455   : > { %v1615_v62 = vpop.eup %1614  ;;  %v995_v63 = vadd.f32 %v985_v60, %v979_v59  ;;  %v1029_v0 = vmul.f32 %v1016_v61, %v1005_v56 }
 0x456   : > { %1151 = vperm.xlu2 %1583, %v1615_v62   ;;  %v1138_v2 = vld [vmem:[#allocation6 + $0x10] sm:$0xff] }
 0x457   : > { %1000 = vst.msk [vmem:[#allocation6] sm:$0xff] %vm666_vm11, %v995_v63  ;;  %v1118_v3 = vadd.f32 %v1075_v55, %v1029_v0  ;;  %v1077_v4 = vpop.f32.mrf.mxu0  ;;  %v1094_v5 = vpop.f32.mrf.mxu1  ;;  %1616 = vrcp.f32 %v1138_v2 }
 0x458   : > { %v1119_v6 = vadd.f32 %v1094_v5, %v1030_v1 }
 0x459   : > { %1122 = vst.msk [vmem:[#allocation7 + $0x8] sm:$0xff] %vm675_vm9, %v1118_v3 }
 0x45a   : > { %1123 = vst.msk [vmem:[#allocation7 + $0x10] sm:$0xff] %vm675_vm9, %v1119_v6 }
 0x45d   : > { %v1617_v7 = vpop.eup %1616 }
 0x45e   : > { %1010 = vperm.xlu2 %1583, %v1613_v42   ;;  %1156 = vperm.xlu0 %1581, %v1617_v7   ;;  %v1136_v8 = vld [vmem:[#allocation6] sm:$0xff] }
 0x45f   : > { %v1096_v9 = vpop.f32.mrf.mxu1  ;;  %1618 = vrcp.f32 %v1136_v8 }
 0x460   : > { %v1133_v17 = vld [vmem:[#allocation7 + $0x8] sm:$0xff] }
 0x461   : > { %v1134_v27 = vld [vmem:[#allocation7 + $0x10] sm:$0xff] }
 0x465   : > { %v1619_v10 = vpop.eup %1618  ;;  %v1056_v11 = vpop.f32.mrf.mxu3 }
 0x466   : > { %1146 = vperm.xlu0 %1581, %v1619_v10  }
 0x467   : > { %v1026_v13 = vpop.permute.xlu0 %1025 }
 0x468   : > { %v1031_v14 = vmul.f32 %v1026_v13, %v1007_v12 }
 0x46a   : > { %v1120_v15 = vadd.f32 %v1113_v46, %v1031_v14 }
 0x46c   : > { %1124 = vst.msk [vmem:[#allocation7 + $0x18] sm:$0xff] %vm675_vm9, %v1120_v15 }
 0x46d   : > { %v1058_v16 = vpop.f32.mrf.mxu3 }
 0x473   : > { %v1135_v22 = vld [vmem:[#allocation7 + $0x18] sm:$0xff] }
 0x4b0   : > { %v1152_v18 = vpop.permute.xlu2 %1151 }
 0x4b1   : > { %v1165_v19 = vmul.f32 %v1152_v18, %v1133_v17 }
 0x4b3   : > { %1169 = vrot.lane.b32.xlu1 %v1165_v19, %s1913_s4 }
 0x4b7   : > { %v1162_v21 = vpop.permute.xlu1 %1161 }
 0x4b8   : > { %v1167_v23 = vmul.f32 %v1162_v21, %v1135_v22  ;;  %v1011_v24 = vpop.permute.xlu2 %1010 }
 0x4b9   : > { %v1028_v25 = vmul.f32 %v1011_v24, %v1004_v20 }
 0x4ba   : > { %1177 = vrot.lane.b32.xlu0 %v1167_v23, %s1914_s6 }
 0x4bb   : > { %v1117_v26 = vadd.f32 %v1056_v11, %v1028_v25 }
 0x4bd   : > { %1121 = vst.msk [vmem:[#allocation7] sm:$0xff] %vm675_vm9, %v1117_v26 }
 0x4c4   : > { %v1132_v33 = vld [vmem:[#allocation7] sm:$0xff] }
 0x4d0   : > { %v1157_v28 = vpop.permute.xlu0 %1156 }
 0x4d1   : > { %v1166_v30 = vmul.f32 %v1157_v28, %v1134_v27 }
 0x4d3   : > { %1173 = vrot.lane.b32.xlu2 %v1166_v30, %s1915_s21 }
 0x4d8   : > { %v1147_v32 = vpop.permute.xlu0 %1146 }
 0x4d9   : > { %v1164_v35 = vmul.f32 %v1147_v32, %v1132_v33 }
 0x525   : > { %v1170_v34 = vpop.permute.xlu1 %1169 }
 0x526   : > { %v1180_v37 = vsel %vm675_vm9, %v1164_v35, %v1170_v34 }
 0x52c   : > { %v1178_v36 = vpop.permute.xlu0 %1177 }
 0x52d   : > { %v1174_v38 = vpop.permute.xlu2 %1173 }
 0x52e   : > { %v1182_v39 = vsel %vm1181_vm12, %v1180_v37, %v1174_v38 }
 0x52f   : > { %v1184_v40 = vsel %vm1183_vm13, %v1182_v39, %v1178_v36 }
 0x530   : > { %v1185_v41 = vpack.c.bf16 %v1184_v40, %v1184_v40 }
 0x532   : > { %1448 = vmatmul.msk.bf16.vlgmr.msra.gmra.mxu3 %vm571_vm0, %v1185_v41 }
 0x5b5   : > { %v1218_v44 = vpop.f32.mrf.mxu3 }
 0x5b6   : > { %v1219_v46 = vadd.f32 %v1589_v43, %v1218_v44 }
 0x5b8   : > { %1222 = vst.msk [vmem:[%s562_s18] sm:$0xff] %vm571_vm0, %v1219_v46 }
 0x5b9   : > { %1827 = shalt.err (!%p1824_p13)
}
 0x5ba   : > { %1481 = dma.vmem_to_hbm [thread:$0]  (%p2073_p2), %s1238_s30, 128, %s1240_s15, %s1224_s11  }
 0x5bd   : > { %v1220_v47 = vpop.f32.mrf.mxu3 }
 0x5be PF: > { %s2358_s10 = sld [smem:[#allocation26_spill]]  ;;  %p1504_p0 = pnand %p1392_p6, %p2080_p5 }
 0x5c0   : > { %p1505_p4 = pneg %p1504_p0 }
 0x5c4   : > { %s1251_s23 = sand.u32 1, %s2358_s10  }
 0x5c5   : > { %s1252_s25 = scalar_lea.sflag [#allocation10], %s1251_s23 }
 0x5c6   : > { %1873 = dma.done.wait (%p1505_p4), %s1252_s25, 128  }
 0x5c7   : > { %1875 = vsyncadd (%p1505_p4), %s1252_s25, 4294967168  ;;  %s33_s26 = sadd.s32 1, %s1898_s26   ;;  %s2360_s13 = sld [smem:[#allocation27_spill]] }
 0x5c8   : > { %p30_p7 = scmp.ge.s32.totalorder %s33_s26, 4   ;;  %s2361_s23 = sld [smem:[#allocation31_spill]] }
 0x5c9   : > { %s2362_s24 = sld [smem:[#allocation28_spill]]  ;;  %s2364_s21 = smov %s1882_s22 }
 0x5ca   : > { %s2363_s25 = sld [smem:[#allocation29_spill]]  ;;  %32 = sbr.rel (!%p30_p7) target bundleno = 17 (0x11), region = 159 }
 0x5cd   : > { %s2365_s22 = smov %s2360_s13 }
 0x5cf   :  { %1258 = vsyncpa [#allocation9], 1 }
 0x5d0   :  { %1260 = vsyncpa [#allocation9 + $0x1], 1 }
 0x5d1   :  { %1261 = vsyncpa [#allocation12], 1 }
 0x5d2   :  { %1263 = vsyncpa [#allocation12 + $0x1], 1 }
 0x5d3   :  { %1264 = vsyncpa [#allocation15], 1 }
 0x5d4   :  { %1265 = vsyncpa [#allocation18], 1 }
 0x5d5   :  { %1266 = vsyncpa [#allocation10], 1 }
 0x5d6   :  { %1268 = vsyncpa [#allocation10 + $0x1], 1 }

</bundles_post_ra>
